<compile_context>
chip_gen: v7x
topology: tpu7x:2x2x1
jax: 0.10.0
libtpu: 0.0.40
codegen_flags: <defaults>
</compile_context>

<pallas_src>
import jax
import jax.numpy as jnp
from jax import lax
from jax.experimental import pallas as pl
from jax.experimental.pallas import tpu as pltpu


def _round_up(x: int, m: int) -> int:
    return ((x + m - 1) // m) * m


def _softplus(x):
    # numerically stable softplus(x) = log(1 + exp(x)), f32 math.
    return jnp.maximum(x, 0.0) + jnp.log(1.0 + jnp.exp(-jnp.abs(x)))


def _vmem_limit_bytes() -> int:
    """Per-generation VMEM budget (v7x has 64 MiB/TC, v5e/v6e have 128 MiB)."""
    cap = 128 * 1024 * 1024
    try:
        info = pltpu.get_tpu_info()
        cap = int(getattr(info, "vmem_capacity_bytes", cap))
    except Exception:
        pass
    return max(32 * 1024 * 1024, min((cap * 3) // 4, 100 * 1024 * 1024))


# --------------------------- pass 1: selection ----------------------------- #

def _selection_kernel(key_ref, zimg_ref, ztxt_ref, scale_ref, bias_ref,
                      zsel_ref, cost_ref):
    k = pl.program_id(1)                      # image chunk index (sequential)
    TI = ztxt_ref.shape[0]
    SC = zimg_ref.shape[0]

    scale = scale_ref[0, 0]
    bias = bias_ref[0, 0]
    BIG = jnp.float32(3.0e38)

    @pl.when(k == 0)
    def _():
        cost_ref[...] = jnp.full(cost_ref.shape, BIG, jnp.float32)
        zsel_ref[...] = jnp.zeros(zsel_ref.shape, zsel_ref.dtype)

    ztxt_i = ztxt_ref[...]                    # (TI, D) bf16, pre-normalized
    zimg_c = zimg_ref[...]                    # (SC, D) bf16, pre-normalized
    key_c = key_ref[...]                      # (1, SC) int32, padded rows = -1

    # logits of every text in tile i against every image of chunk k: (TI, SC)
    logits = lax.dot_general(ztxt_i, zimg_c, (((1,), (1,)), ((), ())),
                             preferred_element_type=jnp.float32)
    logits = logits * scale + bias

    text_ids = (pl.program_id(0) * TI
                + lax.broadcasted_iota(jnp.int32, (TI, SC), 0))
    onehot = text_ids == key_c                # (TI, SC) candidate mask
    # softplus(-x) is strictly decreasing => argmin softplus(-logit) == argmin(-logit)
    cost = jnp.where(onehot, -logits, BIG)
    chunk_min = jnp.min(cost, axis=1, keepdims=True)               # (TI, 1)

    # within-chunk tie-break: smallest image index
    img_ids = lax.broadcasted_iota(jnp.int32, (TI, SC), 1)
    is_min = (cost <= chunk_min) & onehot
    best_local = jnp.min(jnp.where(is_min, img_ids, SC),
                         axis=1, keepdims=True)                     # (TI, 1)
    sel = (img_ids == best_local).astype(jnp.bfloat16)              # (TI, SC)

    # exact gather of the chunk-best image row per text (0/1 matmul, one hit/row)
    chunk_zsel = lax.dot_general(sel, zimg_c, (((1,), (0,)), ((), ())),
                                 preferred_element_type=jnp.float32
                                 ).astype(jnp.bfloat16)             # (TI, D)

    # cross-chunk update: strict '<' keeps the earlier (smaller-index) image on ties
    is_better = chunk_min < cost_ref[...]                           # (TI, 1)
    zsel_ref[...] = jnp.where(is_better, chunk_zsel, zsel_ref[...])
    cost_ref[...] = jnp.where(is_better, chunk_min, cost_ref[...])


# ----------------------------- pass 2: loss -------------------------------- #

def _loss_kernel(zsel_ref, ztxt_ref, vrow_ref, vcol_ref, scale_ref, bias_ref,
                 loss_ref, acc_ref):
    i = pl.program_id(0)
    j = pl.program_id(1)
    TI = zsel_ref.shape[0]
    TJ = ztxt_ref.shape[0]

    scale = scale_ref[0, 0]
    bias = bias_ref[0, 0]

    @pl.when(j == 0)
    def _():
        acc_ref[...] = jnp.zeros(acc_ref.shape, jnp.float32)

    fl = lax.dot_general(zsel_ref[...], ztxt_ref[...], (((1,), (1,)), ((), ())),
                         preferred_element_type=jnp.float32)
    fl = fl * scale + bias                                           # (TI, TJ)
    pair_mask = vrow_ref[...] * vcol_ref[...]                        # (TI, TJ)

    row0 = i * TI
    col0 = j * TJ
    has_diag = (row0 < col0 + TJ) & (col0 < row0 + TI)

    @pl.when(has_diag)
    def _():
        r = row0 + lax.broadcasted_iota(jnp.int32, (TI, TJ), 0)
        c = col0 + lax.broadcasted_iota(jnp.int32, (TI, TJ), 1)
        # labels are +1 on the global diagonal, -1 elsewhere: softplus(-(label*fl))
        signed = jnp.where(r == c, -fl, fl)
        acc_ref[...] += jnp.sum(_softplus(signed) * pair_mask,
                                axis=0, keepdims=True)

    @pl.when(jnp.logical_not(has_diag))
    def _():
        # off-diagonal tiles: labels are all -1 -> softplus(fl); no iota/select
        acc_ref[...] += jnp.sum(_softplus(fl) * pair_mask,
                                axis=0, keepdims=True)

    @pl.when(j == pl.num_programs(1) - 1)
    def _():
        loss_ref[...] = jnp.full((1, 1, 1), jnp.sum(acc_ref[...]), jnp.float32)


# ------------------------------- wrapper ----------------------------------- #

def siglip_loss_with_ambiguity(image_features, text_features, key,
                               logit_scale, logit_bias=None, *,
                               tile_i=512, tile_j=256, img_chunk=512):
    """pick_best_candidate=True variant; returns a scalar f32 loss."""
    s, dim = image_features.shape
    n, dim_t = text_features.shape
    if dim != dim_t:
        raise ValueError(f"Image/text embedding dims must match ({dim} vs {dim_t}).")
    if s == 0 or n == 0:
        return jnp.float32(0.0)

    # ---- wrapper-side fused pre-normalization; bf16 MXU operands ----
    img32 = jnp.asarray(image_features, jnp.float32)
    txt32 = jnp.asarray(text_features, jnp.float32)
    eps2 = jnp.float32(1e-24)
    zimg = (img32 * lax.rsqrt(jnp.sum(img32 * img32, -1, keepdims=True) + eps2)
            ).astype(jnp.bfloat16)
    ztxt = (txt32 * lax.rsqrt(jnp.sum(txt32 * txt32, -1, keepdims=True) + eps2)
            ).astype(jnp.bfloat16)

    # ---- per-text validity + num_valid (wrapper scatter, not in-kernel) ----
    key_i32 = jnp.asarray(key, jnp.int32)
    valid = jnp.zeros((n,), jnp.float32).at[key_i32].set(1.0)
    num_valid = jnp.sum(valid)

    # ---- tile sizes (lane-dense, fitted to the per-generation VMEM budget) ----
    D = _round_up(dim, 128)
    ti = min(int(tile_i), _round_up(n, 128))        # row tile (selected images)
    tj = min(int(tile_j), ti)                       # streamed text column tile
    ti = _round_up(ti, tj)                          # row tile multiple of tj
    sc = min(int(img_chunk), _round_up(s, 128))     # streamed image chunk

    limit = _vmem_limit_bytes()

    def _footprint(ti_, tj_, sc_):
        sel_b = 2 * 2 * (sc_ * D + 2 * ti_ * D) + 2 * 4 * 8 * sc_ + 4 * 128 * ti_
        loss_b = (2 * 2 * (ti_ * D + tj_ * D)
                  + 2 * 4 * (128 * ti_ + 8 * tj_) + 4 * 8 * tj_)
        return max(sel_b, loss_b)

    while _footprint(ti, tj, sc) > limit and (ti > 128 or sc > 128):
        if ti >= sc and ti > 128:
            ti = max(128, (ti // 2 // 128) * 128)
            tj = min(tj, ti)
            if ti % tj:
                tj = 128
        else:
            sc = max(128, (sc // 2 // 128) * 128)

    N = _round_up(n, ti)
    S = _round_up(s, sc)
    ni, nj, nk = N // ti, N // tj, S // sc

    # ---- padded, kernel-ready operands ----
    zimg_p = jnp.pad(zimg, ((0, S - s), (0, D - dim)))
    ztxt_p = jnp.pad(ztxt, ((0, N - n), (0, D - dim)))
    key_row = jnp.pad(key_i32, (0, S - s), constant_values=-1).reshape(1, S)
    valid_row = jnp.pad(valid, (0, N - n)).reshape(N, 1)
    valid_col = jnp.pad(valid, (0, N - n)).reshape(1, N)

    scale2d = jnp.asarray(logit_scale, jnp.float32).reshape(1, 1)
    bias2d = jnp.asarray(0.0 if logit_bias is None else logit_bias,
                         jnp.float32).reshape(1, 1)

    cparams = pltpu.CompilerParams(
        dimension_semantics=("parallel", "arbitrary"),
        vmem_limit_bytes=limit)

    # ---- pass 1: best-candidate selection (images streamed in S-chunks) ----
    sel_cost = pl.CostEstimate(
        flops=int(4 * N * S * D),
        transcendentals=0,
        bytes_accessed=int(2 * (ni * S * D + 2 * N * D) + 4 * ni * S),
    )
    zsel = pl.pallas_call(
        _selection_kernel,
        out_shape=jax.ShapeDtypeStruct((N, D), jnp.bfloat16),
        grid_spec=pltpu.PrefetchScalarGridSpec(
            num_scalar_prefetch=0,
            grid=(ni, nk),
            in_specs=[
                pl.BlockSpec((1, sc), lambda i, k: (0, k)),        # key row
                pl.BlockSpec((sc, D), lambda i, k: (k, 0)),        # image chunk
                pl.BlockSpec((ti, D), lambda i, k: (i, 0)),        # text row tile
                pl.BlockSpec(memory_space=pltpu.MemorySpace.SMEM),  # logit_scale
                pl.BlockSpec(memory_space=pltpu.MemorySpace.SMEM),  # logit_bias
            ],
            out_specs=pl.BlockSpec((ti, D), lambda i, k: (i, 0)),   # selected rows
            scratch_shapes=[pltpu.VMEM((ti, 1), jnp.float32)],      # running best cost
        ),
        compiler_params=cparams,
        cost_estimate=sel_cost,
    )(key_row, zimg_p, ztxt_p, scale2d, bias2d)

    # ---- pass 2: masked SigLIP loss over (selected image, text) pairs ----
    loss_cost = pl.CostEstimate(
        flops=int(2 * N * N * D + 6 * N * N),
        transcendentals=int(2 * N * N),
        bytes_accessed=int(2 * (ni * N * D + N * D) + 8 * N + 4 * ni),
    )
    loss_parts = pl.pallas_call(
        _loss_kernel,
        out_shape=jax.ShapeDtypeStruct((ni, 1, 1), jnp.float32),
        grid_spec=pltpu.PrefetchScalarGridSpec(
            num_scalar_prefetch=0,
            grid=(ni, nj),
            in_specs=[
                pl.BlockSpec((ti, D), lambda i, j: (i, 0)),        # selected images
                pl.BlockSpec((tj, D), lambda i, j: (j, 0)),        # text column tile
                pl.BlockSpec((ti, 1), lambda i, j: (i, 0)),        # row validity
                pl.BlockSpec((1, tj), lambda i, j: (0, j)),        # column validity
                pl.BlockSpec(memory_space=pltpu.MemorySpace.SMEM),  # logit_scale
                pl.BlockSpec(memory_space=pltpu.MemorySpace.SMEM),  # logit_bias
            ],
            out_specs=pl.BlockSpec((1, 1, 1), lambda i, j: (i, 0, 0)),
            scratch_shapes=[pltpu.VMEM((1, tj), jnp.float32)],      # vector accumulator
        ),
        compiler_params=cparams,
        cost_estimate=loss_cost,
    )(zsel, ztxt_p, valid_row, valid_col, scale2d, bias2d)

    total = jnp.sum(loss_parts)
    return jnp.where(num_valid > 0,
                     total / jnp.maximum(num_valid, 1.0),
                     jnp.float32(0.0))


# ------------------------------ references --------------------------------- #

def _reference_loss_f32(img, txt, key, scale, bias):
    """Faithful f32 mirror of the PyTorch forward (pick_best_candidate=True)."""
    img = img.astype(jnp.float32)
    txt = txt.astype(jnp.float32)
    zimg = img / (jnp.linalg.norm(img, axis=-1, keepdims=True) + 1e-12)
    ztxt = txt / (jnp.linalg.norm(txt, axis=-1, keepdims=True) + 1e-12)
    all_logits = zimg @ ztxt.T * scale + bias
    s, n = all_logits.shape
    tp = all_logits[jnp.arange(s), key]
    pot = jax.nn.softplus(-tp)
    onehot = key[:, None] == jnp.arange(n)[None, :]
    cost = jnp.where(onehot, pot[:, None], jnp.inf)
    best = jnp.argmin(cost, axis=0)
    valid = onehot.any(axis=0)
    zsel = jnp.where(valid[:, None], zimg[best], 0.0)
    fl = zsel @ ztxt.T * scale + bias
    labels = 2.0 * jnp.eye(n) - 1.0
    lt = jax.nn.softplus(-(labels * fl))
    mask = valid[:, None] & valid[None, :]
    nv = valid.sum()
    return jnp.where(nv > 0, jnp.sum(jnp.where(mask, lt, 0.0)) / nv, 0.0)


def _reference_loss_bf16_mxu(img, txt, key, scale, bias):
    """Mirror of the kernel's precision: bf16 MXU operands, f32 everything else."""
    img = img.astype(jnp.float32)
    txt = txt.astype(jnp.float32)
    zimg = img * lax.rsqrt(jnp.sum(img * img, -1, keepdims=True) + 1e-24)
    ztxt = txt * lax.rsqrt(jnp.sum(txt * txt, -1, keepdims=True) + 1e-24)
    zi = zimg.astype(jnp.bfloat16)
    zt = ztxt.astype(jnp.bfloat16)
    all_logits = jnp.dot(zi, zt.T, preferred_element_type=jnp.float32) * scale + bias
    s, n = all_logits.shape
    tp = all_logits[jnp.arange(s), key]
    onehot = key[:, None] == jnp.arange(n)[None, :]
    cost = jnp.where(onehot, -tp[:, None], jnp.inf)   # argmin(softplus(-x)) == argmin(-x)
    best = jnp.argmin(cost, axis=0)
    valid = onehot.any(axis=0)
    zsel = jnp.where(valid[:, None], zi[best], jnp.bfloat16(0))
    fl = jnp.dot(zsel, zt.T, preferred_element_type=jnp.float32) * scale + bias
    labels = 2.0 * jnp.eye(n, dtype=jnp.float32) - 1.0
    lt = jax.nn.softplus(-(labels * fl))
    mask = valid[:, None] & valid[None, :]
    nv = valid.sum()
    return jnp.where(nv > 0, jnp.sum(jnp.where(mask, lt, 0.0)) / nv, 0.0)


if __name__ == "__main__":
    rng = jax.random.PRNGKey(0)
    keys = jax.random.split(rng, 9)
    scale = jnp.float32(10.0)   # already-exponentiated temperature
    bias = jnp.float32(-5.0)

    def _check(img, txt, key, **kw):
        loss = jax.block_until_ready(
            siglip_loss_with_ambiguity(img, txt, key, scale, bias, **kw))
        ref_mxu = _reference_loss_bf16_mxu(img, txt, key, scale, bias)
        ref_f32 = _reference_loss_f32(img, txt, key, scale, bias)
        # tight check vs the precision-matched reference
        assert jnp.allclose(loss, ref_mxu, rtol=1e-3, atol=1e-3), (loss, ref_mxu)
        # sanity check vs the faithful full-f32 reference (bf16 MXU tolerance)
        assert jnp.allclose(loss, ref_f32, rtol=0.15, atol=0.15), (loss, ref_f32)

    # --- small single-tile config (f32 inputs) ---
    s, n, dim = 8, 6, 32
    img = jax.random.normal(keys[0], (s, dim), dtype=jnp.float32)
    txt = jax.random.normal(keys[1], (n, dim), dtype=jnp.float32)
    key = jax.random.randint(keys[2], (s,), 0, n, dtype=jnp.int32)
    _check(img, txt, key, tile_i=128, tile_j=128, img_chunk=128)

    # --- multi-tile loss grid (exercises diag / off-diag paths + accumulation) ---
    s, n, dim = 64, 300, 96
    img = jax.random.normal(keys[3], (s, dim), dtype=jnp.float32)
    txt = jax.random.normal(keys[4], (n, dim), dtype=jnp.float32)
    key = jax.random.randint(keys[5], (s,), 0, n, dtype=jnp.int32)
    _check(img, txt, key, tile_i=128, tile_j=128, img_chunk=128)

    # --- multi-chunk selection pass (images streamed in 3 chunks), ti != tj ---
    s, n, dim = 300, 200, 160
    img = jax.random.normal(keys[6], (s, dim), dtype=jnp.float32)
    txt = jax.random.normal(keys[7], (n, dim), dtype=jnp.float32)
    key = jax.random.randint(keys[8], (s,), 0, n, dtype=jnp.int32)
    _check(img, txt, key, tile_i=256, tile_j=128, img_chunk=128)

    # --- native-bf16 inputs, default tiles / default chunking ---
    _check(img.astype(jnp.bfloat16), txt.astype(jnp.bfloat16), key)

    print("KERNEL_OK")
</pallas_src>

<mosaic_0001>
module attributes {stable_mosaic.version = 11 : i64} {
  func.func @_selection_kernel(%arg0: i32, %arg1: i32, %arg2: memref<1x128xi32, #tpu.memory_space<vmem>>, %arg3: memref<128x128xbf16, #tpu.memory_space<vmem>>, %arg4: memref<128x128xbf16, #tpu.memory_space<vmem>>, %arg5: memref<1x1xf32, #tpu.memory_space<smem>>, %arg6: memref<1x1xf32, #tpu.memory_space<smem>>, %arg7: memref<128x128xbf16, #tpu.memory_space<vmem>>, %arg8: memref<128x1xf32, #tpu.memory_space<vmem>>) attributes {dimension_semantics = [#tpu.dimension_semantics<parallel>, #tpu.dimension_semantics<arbitrary>], iteration_bounds = array<i64: 1, 1>, scalar_prefetch = 0 : i64, scratch_operands = 1 : i64, tpu.core_type = #tpu.core_type<tc>, window_params = [{transform_indices = @transform_0, window_bounds = array<i64: 1, 128>}, {transform_indices = @transform_1, window_bounds = array<i64: 128, 128>}, {transform_indices = @transform_2, window_bounds = array<i64: 128, 128>}, {transform_indices = @transform_3, window_bounds = array<i64: 1, 1>}, {transform_indices = @transform_4, window_bounds = array<i64: 1, 1>}, {transform_indices = @transform_5, window_bounds = array<i64: 128, 128>}]} {
    %c0 = arith.constant 0 : index
    %c0_0 = arith.constant 0 : index
    %0 = memref.load %arg5[%c0, %c0_0] : memref<1x1xf32, #tpu.memory_space<smem>>
    %c0_1 = arith.constant 0 : index
    %c0_2 = arith.constant 0 : index
    %1 = memref.load %arg6[%c0_1, %c0_2] : memref<1x1xf32, #tpu.memory_space<smem>>
    %c0_i32 = arith.constant 0 : i32
    %2 = arith.cmpi eq, %arg1, %c0_i32 : i32
    %3 = arith.extui %2 : i1 to i32
    %cst = arith.constant 3.000000e+38 : f32
    %c0_i32_3 = arith.constant 0 : i32
    %4 = arith.cmpi ne, %3, %c0_i32_3 : i32
    scf.if %4 {
      %50 = vector.broadcast %cst : f32 to vector<128x1xf32>
      %c0_27 = arith.constant 0 : index
      %c0_28 = arith.constant 0 : index
      %51 = vector.load %arg8[%c0_27, %c0_28] : memref<128x1xf32, #tpu.memory_space<vmem>>, vector<128x1xf32>
      tpu.vector_store %arg8[%c0_27, %c0_28], %50 {strides = array<i32>} : memref<128x1xf32, #tpu.memory_space<vmem>>, vector<128x1xf32>,
      %cst_29 = arith.constant 0.000000e+00 : bf16
      %52 = vector.broadcast %cst_29 : bf16 to vector<128x128xbf16>
      %c0_30 = arith.constant 0 : index
      %c0_31 = arith.constant 0 : index
      %53 = vector.load %arg7[%c0_30, %c0_31] : memref<128x128xbf16, #tpu.memory_space<vmem>>, vector<128x128xbf16>
      tpu.vector_store %arg7[%c0_30, %c0_31], %52 {strides = array<i32>} : memref<128x128xbf16, #tpu.memory_space<vmem>>, vector<128x128xbf16>,
    } else {
    }
    %c0_4 = arith.constant 0 : index
    %c0_5 = arith.constant 0 : index
    %5 = vector.load %arg4[%c0_4, %c0_5] : memref<128x128xbf16, #tpu.memory_space<vmem>>, vector<128x128xbf16>
    %c0_6 = arith.constant 0 : index
    %c0_7 = arith.constant 0 : index
    %6 = vector.load %arg3[%c0_6, %c0_7] : memref<128x128xbf16, #tpu.memory_space<vmem>>, vector<128x128xbf16>
    %c0_8 = arith.constant 0 : index
    %c0_9 = arith.constant 0 : index
    %7 = vector.load %arg2[%c0_8, %c0_9] : memref<1x128xi32, #tpu.memory_space<vmem>>, vector<1x128xi32>
    %cst_10 = arith.constant dense<0.000000e+00> : vector<128x128xf32>
    %8 = tpu.matmul %5, %6, %cst_10 {dimension_numbers = #tpu.dot_dimension_numbers<[1], [1], [0], [0], [0, 0, 1, 0], [], []>} : vector<128x128xbf16>, vector<128x128xbf16>, vector<128x128xf32> -> vector<128x128xf32>
    %9 = vector.broadcast %0 : f32 to vector<128x128xf32>
    %10 = arith.mulf %8, %9 : vector<128x128xf32>
    %11 = vector.broadcast %1 : f32 to vector<128x128xf32>
    %12 = arith.addf %10, %11 : vector<128x128xf32>
    %c128_i32 = arith.constant 128 : i32
    %13 = arith.muli %arg0, %c128_i32 : i32
    %14 = tpu.iota {dimensions = array<i32: 0>} : vector<128x128xi32>
    %15 = vector.broadcast %13 : i32 to vector<128x128xi32>
    %16 = arith.addi %15, %14 : vector<128x128xi32>
    %17 = vector.broadcast %7 : vector<1x128xi32> to vector<128x128xi32>
    %18 = arith.cmpi eq, %16, %17 : vector<128x128xi32>
    %cst_11 = arith.constant 0.000000e+00 : f32
    %19 = vector.broadcast %cst_11 : f32 to vector<128x128xf32>
    %20 = arith.subf %19, %12 : vector<128x128xf32>
    %cst_12 = arith.constant 3.000000e+38 : f32
    %21 = vector.broadcast %cst_12 : f32 to vector<128x128xf32>
    %22 = arith.select %18, %20, %21 : vector<128x128xi1>, vector<128x128xf32>
    %cst_13 = arith.constant dense<0x7F800000> : vector<128xf32>
    %23 = vector.multi_reduction <minimumf>, %22, %cst_13 [1] : vector<128x128xf32> to vector<128xf32>
    %24 = vector.shape_cast %23 : vector<128xf32> to vector<128x1xf32>
    %25 = tpu.iota {dimensions = array<i32: 1>} : vector<128x128xi32>
    %26 = vector.broadcast %24 : vector<128x1xf32> to vector<128x128xf32>
    %27 = arith.cmpf ole, %22, %26 : vector<128x128xf32>
    %28 = arith.andi %27, %18 : vector<128x128xi1>
    %c128_i32_14 = arith.constant 128 : i32
    %29 = vector.broadcast %c128_i32_14 : i32 to vector<128x128xi32>
    %30 = arith.select %28, %25, %29 : vector<128x128xi1>, vector<128x128xi32>
    %cst_15 = arith.constant dense<2147483647> : vector<128xi32>
    %31 = vector.multi_reduction <minsi>, %30, %cst_15 [1] : vector<128x128xi32> to vector<128xi32>
    %32 = vector.shape_cast %31 : vector<128xi32> to vector<128x1xi32>
    %33 = vector.broadcast %32 : vector<128x1xi32> to vector<128x128xi32>
    %34 = arith.cmpi eq, %25, %33 : vector<128x128xi32>
    %35 = arith.extui %34 : vector<128x128xi1> to vector<128x128xi32>
    %36 = arith.sitofp %35 : vector<128x128xi32> to vector<128x128xf32>
    %37 = arith.truncf %36 : vector<128x128xf32> to vector<128x128xbf16>
    %cst_16 = arith.constant dense<0.000000e+00> : vector<128x128xf32>
    %38 = tpu.matmul %37, %6, %cst_16 {dimension_numbers = #tpu.dot_dimension_numbers<[1], [0], [0], [1], [0, 0, 1, 1], [], []>} : vector<128x128xbf16>, vector<128x128xbf16>, vector<128x128xf32> -> vector<128x128xf32>
    %39 = arith.truncf %38 : vector<128x128xf32> to vector<128x128xbf16>
    %c0_17 = arith.constant 0 : index
    %c0_18 = arith.constant 0 : index
    %40 = vector.load %arg8[%c0_17, %c0_18] : memref<128x1xf32, #tpu.memory_space<vmem>>, vector<128x1xf32>
    %41 = arith.cmpf olt, %24, %40 : vector<128x1xf32>
    %c0_19 = arith.constant 0 : index
    %c0_20 = arith.constant 0 : index
    %42 = vector.load %arg7[%c0_19, %c0_20] : memref<128x128xbf16, #tpu.memory_space<vmem>>, vector<128x128xbf16>
    %43 = vector.shape_cast %41 : vector<128x1xi1> to vector<128x1xi1>
    %44 = vector.broadcast %43 : vector<128x1xi1> to vector<128x128xi1>
    %45 = arith.select %44, %39, %42 : vector<128x128xi1>, vector<128x128xbf16>
    %c0_21 = arith.constant 0 : index
    %c0_22 = arith.constant 0 : index
    %46 = vector.load %arg7[%c0_21, %c0_22] : memref<128x128xbf16, #tpu.memory_space<vmem>>, vector<128x128xbf16>
    tpu.vector_store %arg7[%c0_21, %c0_22], %45 {strides = array<i32>} : memref<128x128xbf16, #tpu.memory_space<vmem>>, vector<128x128xbf16>,
    %c0_23 = arith.constant 0 : index
    %c0_24 = arith.constant 0 : index
    %47 = vector.load %arg8[%c0_23, %c0_24] : memref<128x1xf32, #tpu.memory_space<vmem>>, vector<128x1xf32>
    %48 = arith.select %41, %24, %47 : vector<128x1xi1>, vector<128x1xf32>
    %c0_25 = arith.constant 0 : index
    %c0_26 = arith.constant 0 : index
    %49 = vector.load %arg8[%c0_25, %c0_26] : memref<128x1xf32, #tpu.memory_space<vmem>>, vector<128x1xf32>
    tpu.vector_store %arg8[%c0_25, %c0_26], %48 {strides = array<i32>} : memref<128x1xf32, #tpu.memory_space<vmem>>, vector<128x1xf32>,
    return
  }
  func.func @transform_0(%arg0: i32, %arg1: i32) -> (i32, i32) {
    %c0_i32 = arith.constant 0 : i32
    %c0_i32_0 = arith.constant 0 : i32
    return %c0_i32, %arg1 : i32, i32
  }
  func.func @transform_1(%arg0: i32, %arg1: i32) -> (i32, i32) {
    %c0_i32 = arith.constant 0 : i32
    %c0_i32_0 = arith.constant 0 : i32
    return %arg1, %c0_i32 : i32, i32
  }
  func.func @transform_2(%arg0: i32, %arg1: i32) -> (i32, i32) {
    %c0_i32 = arith.constant 0 : i32
    %c0_i32_0 = arith.constant 0 : i32
    return %arg0, %c0_i32 : i32, i32
  }
  func.func @transform_3(%arg0: i32, %arg1: i32) -> (i32, i32) {
    %c0_i32 = arith.constant 0 : i32
    %c0_i32_0 = arith.constant 0 : i32
    %c0_i32_1 = arith.constant 0 : i32
    return %c0_i32, %c0_i32_0 : i32, i32
  }
  func.func @transform_4(%arg0: i32, %arg1: i32) -> (i32, i32) {
    %c0_i32 = arith.constant 0 : i32
    %c0_i32_0 = arith.constant 0 : i32
    %c0_i32_1 = arith.constant 0 : i32
    return %c0_i32, %c0_i32_0 : i32, i32
  }
  func.func @transform_5(%arg0: i32, %arg1: i32) -> (i32, i32) {
    %c0_i32 = arith.constant 0 : i32
    %c0_i32_0 = arith.constant 0 : i32
    return %arg0, %c0_i32 : i32, i32
  }
}

</mosaic_0001>

<bundles_post_ra>
// kernel: tpu_custom_call.1
= control target key start
LH: loop header
LB: loop body
LE: loop exit
PB: predicated region body
PF: predicated region fallthrough
CT: control target
= control target key end

     0   :  { %12 = vsyncpa [#allocation6], 0  ;;  %s2552_s0 = inlined_call_operand.hbm [shape: s32[1,128], index: 0, kind: input, shape index: {}]   ;;  %s2553_s1 = inlined_call_operand.hbm [shape: bf16[128,128], index: 1, kind: input, shape index: {}]   ;;  %s2554_s2 = inlined_call_operand.hbm [shape: bf16[128,128], index: 2, kind: input, shape index: {}]   ;;  %s2555_s3 = inlined_call_operand.<no memory space> [shape: f32[1,1], index: 3, kind: input, shape index: {}]   ;;  %s2556_s4 = inlined_call_operand.<no memory space> [shape: f32[1,1], index: 4, kind: input, shape index: {}]   ;;  %s2557_s5 = inlined_call_operand.hbm [shape: bf16[128,128], index: 5, kind: output, shape index: {}]  }
   0x1   :  { %13 = vsyncpa [#allocation9], 0 }
   0x2   :  { %14 = vsyncpa [#allocation7], 0  ;;  %s1611_s18 = smov [#allocation8]   ;;  %s1517_s22 = scalar_lea.hbm %s2553_s1, 1024 }
   0x3   :  { %s30_s19 = sshll.u32 %s1611_s18, 4  ;;  %p1518_p0 = scmp.ne.s32.totalorder %s2553_s1, %s1517_s22  ;;  %s31_s19 = int_to_ptr.vmem [resolvable:$true] %s30_s19 }
   0x4   :  { %p1521_p1 = scmp.lt.u32.totalorder %s1517_s22, %s2553_s1 }
   0x6   :  { %p1523_p2 = pnand %p1521_p1, %p1518_p0 }
   0x8   :  { %1526 = shalt.err (!%p1523_p2)
}
   0x9   :  { %s1527_s27 = scalar_lea.vmem %s31_s19, 1024  ;;  %p1532_p4 = scmp.lt.s32.totalorder %s31_s19, %s31_s19 }
   0xa   :  { %p1528_p3 = scmp.ne.s32.totalorder %s31_s19, %s1527_s27  ;;  %p1533_p5 = scmp.lt.s32.totalorder %s1527_s27, %s1527_s27 }
   0xc   :  { %p1534_p6 = por %p1533_p5, %p1532_p4 }
   0xe   :  { %p1535_p7 = pnand %p1534_p6, %p1528_p3 }
  0x10   :  { %1538 = shalt.err (!%p1535_p7)
}
  0x11   :  { %s1612_s28 = smov 64   ;;  %s1613_s29 = smov 4  }
  0x12   :  { %36 = dma.hbm_to_vmem [thread:$0]  %s2553_s1, 1024, %s31_s19, [#allocation9], %s1612_s28, %s1612_s28, %s1613_s29  }
  0x13   :  { %s1614_s7 = smov [#allocation5]   ;;  %s1615_s9 = smov [#allocation10]  }
  0x14   :  { %s21_s8 = sshll.u32 %s1614_s7, 4  ;;  %s42_s10 = sshll.u32 %s1615_s9, 4  ;;  %s22_s8 = int_to_ptr.vmem [resolvable:$true] %s21_s8  ;;  %s43_s10 = int_to_ptr.vmem [resolvable:$true] %s42_s10 }
  0x15   :  { %s1539_s13 = scalar_lea.hbm %s2552_s0, 16 }
  0x16   :  { %p1540_p8 = scmp.ne.s32.totalorder %s2552_s0, %s1539_s13  ;;  %p1543_p9 = scmp.lt.u32.totalorder %s1539_s13, %s2552_s0 }
  0x18   :  { %p1545_p10 = pnand %p1543_p9, %p1540_p8 }
  0x1a   :  { %1548 = shalt.err (!%p1545_p10)
}
  0x1b   :  { %s1549_s1 = scalar_lea.vmem %s22_s8, 16  ;;  %s1553_s18 = scalar_lea.vmem %s22_s8, 32 }
  0x1c   :  { %p1550_p11 = scmp.ne.s32.totalorder %s22_s8, %s1549_s1  ;;  %p1554_p12 = scmp.lt.s32.totalorder %s22_s8, %s22_s8 }
  0x1d   :  { %p1555_p13 = scmp.lt.s32.totalorder %s1553_s18, %s1549_s1 }
  0x1f   :  { %p1556_p0 = por %p1555_p13, %p1554_p12 }
  0x21   :  { %p1557_p1 = pnand %p1556_p0, %p1550_p11 }
  0x23   :  { %1560 = shalt.err (!%p1557_p1)
}
  0x24   :  { %24 = dma.hbm_to_vmem [thread:$0]  %s2552_s0, 16, %s22_s8, [#allocation6]  }
  0x25   :  { %s1561_s23 = scalar_lea.hbm %s2554_s2, 1024 }
  0x26   :  { %p1562_p2 = scmp.ne.s32.totalorder %s2554_s2, %s1561_s23  ;;  %p1565_p3 = scmp.lt.u32.totalorder %s1561_s23, %s2554_s2 }
  0x28   :  { %p1567_p4 = pnand %p1565_p3, %p1562_p2 }
  0x2a   :  { %1570 = shalt.err (!%p1567_p4)
}
  0x2b   :  { %s1571_s30 = scalar_lea.vmem %s43_s10, 1024  ;;  %p1576_p6 = scmp.lt.s32.totalorder %s43_s10, %s43_s10 }
  0x2c   :  { %p1572_p5 = scmp.ne.s32.totalorder %s43_s10, %s1571_s30  ;;  %p1577_p7 = scmp.lt.s32.totalorder %s1571_s30, %s1571_s30 }
  0x2e   :  { %p1578_p8 = por %p1577_p7, %p1576_p6 }
  0x30   :  { %p1579_p9 = pnand %p1578_p8, %p1572_p5 }
  0x32   :  { %1582 = shalt.err (!%p1579_p9)
}
  0x33   :  { %48 = dma.hbm_to_vmem [thread:$0]  %s2554_s2, 1024, %s43_s10, [#allocation9], %s1612_s28, %s1612_s28, %s1613_s29  }
  0x34   :  { %1605 = dma.done.wait [#allocation6], 16  }
  0x35   :  { %1606 = vsyncadd [#allocation6], 4294967280 }
  0x36   :  { %1607 = dma.done.wait [#allocation9], 2048  }
  0x37   :  { %1608 = vsyncadd [#allocation9], 4294965248  ;;  %v1493_v0 = vld [vmem:[#allocation8] sm:$0xff]   ;;  %v1494_v1 = vld [vmem:[#allocation8 + $0x8] sm:$0xff]   ;;  %v365_v16 = vlaneseq  ;;  %v1698_v18 = vstv %s2555_s3  ;;  %v1703_v20 = vstv %s2556_s4  ;;  %vm71_vm5 = vcmask 7168   ;;  %s1619_s3 = smov [#allocation11]  }
  0x38   :  { %1418 = vmatprep.subr.bf16.mxu0 %v1493_v0  ;;  %1450 = vmatprep.subr.bf16.mxu1 %v1493_v0  ;;  %v1495_v2 = vld [vmem:[#allocation8 + $0x10] sm:$0xff]   ;;  %v1501_v3 = vld [vmem:[#allocation10] sm:$0xff]   ;;  %v1496_v4 = vld [vmem:[#allocation8 + $0x18] sm:$0xff]   ;;  %v1616_v60 = vmov 3e+38   ;;  %s1292_s4 = sshll.u32 %s1619_s3, 4  ;;  %s1293_s4 = int_to_ptr.vmem [resolvable:$true] %s1292_s4 }
  0x39   :  { %1419 = vmatpush3.bf16.xpose.msra.mxu0 %v1493_v0  ;;  %1451 = vmatpush3.bf16.msra.mxu1 %v1493_v0  ;;  %v1497_v5 = vld [vmem:[#allocation8 + $0x20] sm:$0xff]   ;;  %v1498_v6 = vld [vmem:[#allocation8 + $0x28] sm:$0xff]   ;;  %v1499_v7 = vld [vmem:[#allocation8 + $0x30] sm:$0xff]   ;;  %v1693_v17 = vshrl.u32 %v365_v16, 7  ;;  %73 = vst.msk [vmem:[#allocation2 + $0x8] sm:$0xff] %vm71_vm5, %v1616_v60  ;;  %s1583_s10 = scalar_lea.vmem %s1293_s4, 1024  ;;  %p1588_p11 = scmp.lt.s32.totalorder %s1293_s4, %s1293_s4 }
  0x3a   :  { %1420 = vmatprep.subr.bf16.mxu0 %v1494_v1  ;;  %1452 = vmatprep.subr.bf16.mxu1 %v1494_v1  ;;  %v1500_v8 = vld [vmem:[#allocation8 + $0x38] sm:$0xff]   ;;  %v1502_v9 = vld [vmem:[#allocation10 + $0x8] sm:$0xff]   ;;  %v1503_v10 = vld [vmem:[#allocation10 + $0x10] sm:$0xff]   ;;  %72 = vst.msk [vmem:[#allocation2] sm:$0xff] %vm71_vm5, %v1616_v60  ;;  %p1584_p10 = scmp.ne.s32.totalorder %s1293_s4, %s1583_s10  ;;  %p1589_p12 = scmp.lt.s32.totalorder %s1583_s10, %s1583_s10 }
  0x3b   :  { %1434 = vmatprep.mubr.bf16.mxu0 %v1501_v3  ;;  %v1504_v11 = vld [vmem:[#allocation10 + $0x18] sm:$0xff]   ;;  %v1505_v12 = vld [vmem:[#allocation10 + $0x20] sm:$0xff]   ;;  %v1506_v13 = vld [vmem:[#allocation10 + $0x28] sm:$0xff]   ;;  %v1706_v21 = vadd.s32 16, %v1693_v17  ;;  %v1719_v32 = vadd.s32 24, %v1693_v17  ;;  %v1725_v35 = vadd.s32 8, %v1693_v17 }
  0x3c   :  { %v1507_v14 = vld [vmem:[#allocation10 + $0x30] sm:$0xff]   ;;  %v1508_v15 = vld [vmem:[#allocation10 + $0x38] sm:$0xff]   ;;  %v1746_v45 = vadd.s32 32, %v1693_v17  ;;  %v1756_v51 = vadd.s32 40, %v1693_v17  ;;  %v1771_v56 = vadd.s32 48, %v1693_v17  ;;  %74 = vst.msk [vmem:[#allocation2 + $0x10] sm:$0xff] %vm71_vm5, %v1616_v60  ;;  %p1590_p13 = por %p1589_p12, %p1588_p11 }
  0x3d   :  { %1453 = vmatpush3.bf16.msra.mxu1 %v1494_v1  ;;  %v1709_v24 = vld [vmem:[#allocation5] ss:$0 sm:$0xff]  ;;  %75 = vst.msk [vmem:[#allocation2 + $0x18] sm:$0xff] %vm71_vm5, %v1616_v60  ;;  %76 = vst.msk [vmem:[#allocation2 + $0x20] sm:$0xff] %vm71_vm5, %v1616_v60  ;;  %v1794_v61 = vadd.s32 56, %v1693_v17 }
  0x3e   :  { %1454 = vmatprep.subr.bf16.mxu1 %v1495_v2  ;;  %vm405_vm0 = vcmp.eq.s32.totalorder %v1706_v21, %v1709_v24  ;;  %vm403_vm1 = vcmp.eq.s32.totalorder %v1693_v17, %v1709_v24  ;;  %vm406_vm2 = vcmp.eq.s32.totalorder %v1719_v32, %v1709_v24  ;;  %vm404_vm3 = vcmp.eq.s32.totalorder %v1725_v35, %v1709_v24  ;;  %p1591_p0 = pnand %p1590_p13, %p1584_p10 }
  0x3f   :  { %vm407_vm4 = vcmp.eq.s32.totalorder %v1746_v45, %v1709_v24  ;;  %77 = vst.msk [vmem:[#allocation2 + $0x28] sm:$0xff] %vm71_vm5, %v1616_v60  ;;  %78 = vst.msk [vmem:[#allocation2 + $0x30] sm:$0xff] %vm71_vm5, %v1616_v60  ;;  %vm408_vm6 = vcmp.eq.s32.totalorder %v1756_v51, %v1709_v24  ;;  %vm409_vm7 = vcmp.eq.s32.totalorder %v1771_v56, %v1709_v24 }
  0x40   :  { %79 = vst.msk [vmem:[#allocation2 + $0x38] sm:$0xff] %vm71_vm5, %v1616_v60  ;;  %80 = vst.msk [vmem:[#allocation2 + $0x40] sm:$0xff] %vm71_vm5, %v1616_v60  ;;  %vm410_vm8 = vcmp.eq.s32.totalorder %v1794_v61, %v1709_v24 }
  0x41   :  { %1421 = vmatpush3.bf16.xpose.msra.mxu0 %v1494_v1  ;;  %1455 = vmatpush3.bf16.msra.mxu1 %v1495_v2  ;;  %81 = vst.msk [vmem:[#allocation2 + $0x48] sm:$0xff] %vm71_vm5, %v1616_v60  ;;  %82 = vst.msk [vmem:[#allocation2 + $0x50] sm:$0xff] %vm71_vm5, %v1616_v60 }
  0x42   :  { %1422 = vmatprep.subr.bf16.mxu0 %v1495_v2  ;;  %1456 = vmatprep.subr.bf16.mxu1 %v1496_v4  ;;  %83 = vst.msk [vmem:[#allocation2 + $0x58] sm:$0xff] %vm71_vm5, %v1616_v60  ;;  %84 = vst.msk [vmem:[#allocation2 + $0x60] sm:$0xff] %vm71_vm5, %v1616_v60 }
  0x43   :  { %85 = vst.msk [vmem:[#allocation2 + $0x68] sm:$0xff] %vm71_vm5, %v1616_v60  ;;  %86 = vst.msk [vmem:[#allocation2 + $0x70] sm:$0xff] %vm71_vm5, %v1616_v60 }
  0x44   :  { %87 = vst.msk [vmem:[#allocation2 + $0x78] sm:$0xff] %vm71_vm5, %v1616_v60 }
  0x45   :  { %1457 = vmatpush3.bf16.msra.mxu1 %v1496_v4 }
  0x46   :  { %1458 = vmatprep.subr.bf16.mxu1 %v1497_v5 }
  0x49   :  { %1423 = vmatpush3.bf16.xpose.msra.mxu0 %v1495_v2  ;;  %1459 = vmatpush3.bf16.msra.mxu1 %v1497_v5 }
  0x4a   :  { %1424 = vmatprep.subr.bf16.mxu0 %v1496_v4  ;;  %1460 = vmatprep.subr.bf16.mxu1 %v1498_v6 }
  0x4d   :  { %1461 = vmatpush3.bf16.msra.mxu1 %v1498_v6 }
  0x4e   :  { %1462 = vmatprep.subr.bf16.mxu1 %v1499_v7 }
  0x51   :  { %1425 = vmatpush3.bf16.xpose.msra.mxu0 %v1496_v4  ;;  %1463 = vmatpush3.bf16.msra.mxu1 %v1499_v7  ;;  %v1806_v4 = vadd.s32 64, %v1693_v17 }
  0x52   :  { %1426 = vmatprep.subr.bf16.mxu0 %v1497_v5  ;;  %1464 = vmatprep.subr.bf16.mxu1 %v1500_v8 }
  0x53   :  { %vm411_vm9 = vcmp.eq.s32.totalorder %v1806_v4, %v1709_v24 }
  0x55   :  { %1465 = vmatpush3.bf16.msra.mxu1 %v1500_v8 }
  0x59   :  { %1427 = vmatpush3.bf16.xpose.msra.mxu0 %v1497_v5 }
  0x5a   :  { %1428 = vmatprep.subr.bf16.mxu0 %v1498_v6 }
  0x61   :  { %1429 = vmatpush3.bf16.xpose.msra.mxu0 %v1498_v6 }
  0x62   :  { %1430 = vmatprep.subr.bf16.mxu0 %v1499_v7 }
  0x69   :  { %1431 = vmatpush3.bf16.xpose.msra.mxu0 %v1499_v7 }
  0x6a   :  { %1432 = vmatprep.subr.bf16.mxu0 %v1500_v8 }
  0x71   :  { %1433 = vmatpush3.bf16.xpose.msra.mxu0 %v1500_v8 }
  0x78   :  { %1435 = vmatmul.mubr.bf16.vlgmr.msra.gmra.mrb[0].mxu0 %v1502_v9 }
  0x79   :  { %1438 = vmatprep.mubr.bf16.mxu0 %v1503_v10 }
  0x80   :  { %1439 = vmatmul.mubr.bf16.gmra.mrb[4].mxu0 %v1504_v11  ;;  %v1819_v11 = vadd.s32 72, %v1693_v17 }
  0x81   :  { %1442 = vmatprep.mubr.bf16.mxu0 %v1505_v12 }
  0x82   :  { %vm2564_vm10 = vcmp.eq.s32.totalorder %v1819_v11, %v1709_v24 }
  0x88   :  { %1443 = vmatmul.mubr.bf16.gmra.mrb[8].mxu0 %v1506_v13 }
  0x89   :  { %1446 = vmatprep.mubr.bf16.mxu0 %v1507_v14 }
  0x90   :  { %1447 = vmatmul.mubr.bf16.gmra.mrb[12].mxu0 %v1508_v15 }
 0x14b   :  { %v1436_v19 = vpop.f32.mrb[0].mxu0 }
 0x14c   :  { %v333_v22 = vmul.f32 %v1436_v19, %v1698_v18  ;;  %v267_v23 = vpop.f32.mrb[1].mxu0 }
 0x14d   :  { %v331_v25 = vmul.f32 %v1698_v18, %v267_v23  ;;  %v1437_v26 = vpop.f32.mrb[2].mxu0  ;;  %v1837_v23 = vadd.s32 88, %v1693_v17 }
 0x14e   :  { %v350_v27 = vadd.f32 %v1703_v20, %v333_v22  ;;  %v334_v28 = vmul.f32 %v1437_v26, %v1698_v18  ;;  %v270_v29 = vpop.f32.mrb[3].mxu0  ;;  %v1834_v22 = vadd.s32 80, %v1693_v17 }
 0x14f   :  { %v348_v30 = vadd.f32 %v1703_v20, %v331_v25  ;;  %v332_v31 = vmul.f32 %v1698_v18, %v270_v29  ;;  %vm2562_vm12 = vcmp.eq.s32.totalorder %v1837_v23, %v1709_v24 }
 0x150   :  { %v351_v33 = vadd.f32 %v1703_v20, %v334_v28  ;;  %v421_v34 = vsub.f32 0.0, %v350_v27  ;;  %v2566_v28 = vmov 0   ;;  %vm2563_vm11 = vcmp.eq.s32.totalorder %v1834_v22, %v1709_v24 }
 0x151   :  { %v349_v36 = vadd.f32 %v1703_v20, %v332_v31  ;;  %v419_v37 = vsub.f32 0.0, %v348_v30  ;;  %88 = vst [vmem:[#allocation11] sm:$0xf] %v2566_v28  ;;  %89 = vst [vmem:[#allocation11 + $0x4] sm:$0xf] %v2566_v28  ;;  %1491 = vset.pattern.permute.xlu0 %v2566_v28  ;;  %1492 = vset.pattern.permute.xlu1 %v2566_v28 }
 0x152   :  { %v1731_v38 = vsel %vm405_vm0, %v421_v34, 3e+38  ;;  %v422_v39 = vsub.f32 0.0, %v351_v33  ;;  %90 = vst [vmem:[#allocation11 + $0x8] sm:$0xf] %v2566_v28 }
 0x153   :  { %455 = vmin.xlane.f32.xlu1 %v1731_v38  ;;  %v1440_v40 = vpop.f32.mrb[4].mxu0  ;;  %v1737_v41 = vsel %vm403_vm1, %v419_v37, 3e+38  ;;  %v420_v42 = vsub.f32 0.0, %v349_v36  ;;  %91 = vst [vmem:[#allocation11 + $0xc] sm:$0xf] %v2566_v28 }
 0x154   :  { %v337_v43 = vmul.f32 %v1440_v40, %v1698_v18  ;;  %451 = vmin.xlane.f32.xlu0 %v1737_v41  ;;  %v283_v44 = vpop.f32.mrb[5].mxu0  ;;  %v1753_v50 = vsel %vm406_vm2, %v422_v39, 3e+38  ;;  %92 = vst [vmem:[#allocation11 + $0x10] sm:$0xf] %v2566_v28  ;;  %v1876_v39 = vadd.s32 96, %v1693_v17 }
 0x155   :  { %v335_v46 = vmul.f32 %v1698_v18, %v283_v44  ;;  %v1441_v47 = vpop.f32.mrb[6].mxu0  ;;  %v1765_v55 = vsel %vm404_vm3, %v420_v42, 3e+38  ;;  %93 = vst [vmem:[#allocation11 + $0x14] sm:$0xf] %v2566_v28 }
 0x156   :  { %v338_v48 = vmul.f32 %v1441_v47, %v1698_v18  ;;  %v286_v49 = vpop.f32.mrb[7].mxu0  ;;  %v354_v52 = vadd.f32 %v1703_v20, %v337_v43  ;;  %94 = vst [vmem:[#allocation11 + $0x18] sm:$0xf] %v2566_v28  ;;  %95 = vst [vmem:[#allocation11 + $0x1c] sm:$0xf] %v2566_v28  ;;  %vm2558_vm13 = vcmp.eq.s32.totalorder %v1876_v39, %v1709_v24 }
 0x157   :  { %v352_v53 = vadd.f32 %v1703_v20, %v335_v46  ;;  %v336_v54 = vmul.f32 %v1698_v18, %v286_v49  ;;  %457 = vmin.xlane.f32.xlu1 %v1753_v50  ;;  %96 = vst [vmem:[#allocation11 + $0x20] sm:$0xf] %v2566_v28  ;;  %97 = vst [vmem:[#allocation11 + $0x24] sm:$0xf] %v2566_v28 }
 0x158   :  { %453 = vmin.xlane.f32.xlu0 %v1765_v55  ;;  %v355_v57 = vadd.f32 %v1703_v20, %v338_v48  ;;  %v425_v1 = vsub.f32 0.0, %v354_v52  ;;  %98 = vst [vmem:[#allocation11 + $0x28] sm:$0xf] %v2566_v28  ;;  %99 = vst [vmem:[#allocation11 + $0x2c] sm:$0xf] %v2566_v28  ;;  %v1890_v48 = vadd.s32 104, %v1693_v17 }
 0x159   :  { %v353_v58 = vadd.f32 %v1703_v20, %v336_v54  ;;  %v423_v59 = vsub.f32 0.0, %v352_v53  ;;  %100 = vst [vmem:[#allocation11 + $0x30] sm:$0xf] %v2566_v28  ;;  %101 = vst [vmem:[#allocation11 + $0x34] sm:$0xf] %v2566_v28  ;;  %v1900_v54 = vadd.s32 112, %v1693_v17 }
 0x15a   :  { %v426_v8 = vsub.f32 0.0, %v355_v57  ;;  %v1827_v15 = vsel %vm409_vm7, %v425_v1, 3e+38  ;;  %102 = vst [vmem:[#allocation11 + $0x38] sm:$0xf] %v2566_v28  ;;  %vm2561_vm14 = vcmp.eq.s32.totalorder %v1890_v48, %v1709_v24 }
 0x15b   :  { %v1444_v62 = vpop.f32.mrb[8].mxu0  ;;  %v1799_v63 = vsel %vm407_vm4, %v423_v59, 3e+38  ;;  %v424_v0 = vsub.f32 0.0, %v353_v58  ;;  %103 = vst [vmem:[#allocation11 + $0x3c] sm:$0xf] %v2566_v28  ;;  %vm2559_vm15 = vcmp.eq.s32.totalorder %v1900_v54, %v1709_v24 }
 0x15c   :  { %v341_v2 = vmul.f32 %v1444_v62, %v1698_v18  ;;  %459 = vmin.xlane.f32.xlu0 %v1799_v63  ;;  %v299_v3 = vpop.f32.mrb[9].mxu0  ;;  %v1843_v26 = vsel %vm410_vm8, %v426_v8, 3e+38  ;;  %v1916_v62 = vadd.s32 120, %v1693_v17  ;;  %v1948_v8 = vld [vmem:[#allocation2] sm:$0xff] }
 0x15d   :  { %v339_v5 = vmul.f32 %v1698_v18, %v299_v3  ;;  %v1445_v6 = vpop.f32.mrb[10].mxu0  ;;  %v1812_v7 = vsel %vm408_vm6, %v424_v0, 3e+38 }
 0x15e   :  { %v342_v9 = vmul.f32 %v1445_v6, %v1698_v18  ;;  %461 = vmin.xlane.f32.xlu1 %v1812_v7  ;;  %v302_v10 = vpop.f32.mrb[11].mxu0  ;;  %v358_v12 = vadd.f32 %v1703_v20, %v341_v2  ;;  %v1946_v6 = vld [vmem:[#allocation2 + $0x10] sm:$0xff] }
 0x15f   :  { %v356_v13 = vadd.f32 %v1703_v20, %v339_v5  ;;  %v340_v14 = vmul.f32 %v1698_v18, %v302_v10 }
 0x160   :  { %v359_v19 = vadd.f32 %v1703_v20, %v342_v9  ;;  %463 = vmin.xlane.f32.xlu0 %v1827_v15  ;;  %v429_v33 = vsub.f32 0.0, %v358_v12  ;;  %v1951_v9 = vand.u32 127, %v365_v16 }
 0x161   :  { %v357_v25 = vadd.f32 %v1703_v20, %v340_v14  ;;  %v427_v27 = vsub.f32 0.0, %v356_v13 }
 0x162   :  { %465 = vmin.xlane.f32.xlu1 %v1843_v26  ;;  %v430_v37 = vsub.f32 0.0, %v359_v19  ;;  %v1897_v53 = vsel %vm2563_vm11, %v429_v33, 3e+38  ;;  %2584 = vst [vmem:[#allocation15_spill] sm:$0xff] %v1951_v9 }
 0x163   :  { %v1448_v29 = vpop.f32.mrb[12].mxu0  ;;  %v1868_v30 = vsel %vm411_vm9, %v427_v27, 3e+38  ;;  %v428_v31 = vsub.f32 0.0, %v357_v25 }
 0x164   :  { %v345_v34 = vmul.f32 %v1448_v29, %v1698_v18  ;;  %467 = vmin.xlane.f32.xlu0 %v1868_v30  ;;  %v315_v36 = vpop.f32.mrb[13].mxu0  ;;  %v1907_v58 = vsel %vm2562_vm12, %v430_v37, 3e+38  ;;  %v2015_v29 = vld [vmem:[#allocation2 + $0x20] sm:$0xff] }
 0x165   :  { %v343_v40 = vmul.f32 %v1698_v18, %v315_v36  ;;  %v1449_v42 = vpop.f32.mrb[14].mxu0  ;;  %v1882_v43 = vsel %vm2564_vm10, %v428_v31, 3e+38  ;;  %v2038_v36 = vld [vmem:[#allocation2 + $0x28] sm:$0xff] }
 0x166   :  { %v362_v44 = vadd.f32 %v1703_v20, %v345_v34  ;;  %v346_v46 = vmul.f32 %v1449_v42, %v1698_v18  ;;  %469 = vmin.xlane.f32.xlu1 %v1882_v43  ;;  %v318_v47 = vpop.f32.mrb[15].mxu0 }
 0x167   :  { %v360_v49 = vadd.f32 %v1703_v20, %v343_v40  ;;  %v344_v52 = vmul.f32 %v1698_v18, %v318_v47 }
 0x168   :  { %v363_v57 = vadd.f32 %v1703_v20, %v346_v46  ;;  %471 = vmin.xlane.f32.xlu0 %v1897_v53  ;;  %v433_v60 = vsub.f32 0.0, %v362_v44  ;;  %v2060_v46 = vld [vmem:[#allocation2 + $0x30] sm:$0xff] }
 0x169   :  { %v361_v18 = vadd.f32 %v1703_v20, %v344_v52  ;;  %v431_v59 = vsub.f32 0.0, %v360_v49  ;;  %2585 = vst [vmem:[#allocation16_spill] sm:$0xff] %v2060_v46 }
 0x16a   :  { %473 = vmin.xlane.f32.xlu1 %v1907_v58  ;;  %v434_v20 = vsub.f32 0.0, %v363_v57  ;;  %v1935_v3 = vsel %vm2559_vm15, %v433_v60, 3e+38 }
 0x16b   :  { %v1921_v0 = vsel %vm2558_vm13, %v431_v59, 3e+38  ;;  %v432_v1 = vsub.f32 0.0, %v361_v18  ;;  %vm2560_vm13 = vcmp.eq.s32.totalorder %v1916_v62, %v1709_v24 }
 0x16c   :  { %475 = vmin.xlane.f32.xlu0 %v1921_v0  ;;  %v1943_v5 = vsel %vm2560_vm13, %v434_v20, 3e+38 }
 0x16d   :  { %v1929_v2 = vsel %vm2561_vm14, %v432_v1, 3e+38 }
 0x16e   :  { %477 = vmin.xlane.f32.xlu1 %v1929_v2 }
 0x170   :  { %479 = vmin.xlane.f32.xlu0 %v1935_v3 }
 0x172   :  { %481 = vmin.xlane.f32.xlu1 %v1943_v5 }
 0x1e0   :  { %v1953_v10 = vpop.xlane.xlu1 %455 }
 0x1e1   :  { %vm487_vm15 = vcmp.le.f32.partialorder %v1731_v38, %v1953_v10  ;;  %v1957_v12 = vpop.xlane.xlu0 %451  ;;  %vm936_vm13 = vcmp.lt.f32.partialorder %v1953_v10, %v1946_v6  ;;  %v1976_v38 = vld [vmem:[#allocation2 + $0x8] sm:$0xff] }
 0x1e2   :  { %vm485_vm14 = vcmp.le.f32.partialorder %v1737_v41, %v1957_v12  ;;  %vm503_vm12 = vmand %vm487_vm15, %vm405_vm0  ;;  %vm934_vm11 = vcmp.lt.f32.partialorder %v1957_v12, %v1948_v8  ;;  %v1256_v16 = vsel %vm936_vm13, %v1953_v10, %v1946_v6  ;;  %v1984_v41 = vld [vmem:[#allocation2 + $0x18] sm:$0xff] }
 0x1e3   :  { %vm501_vm10 = vmand %vm485_vm14, %vm403_vm1  ;;  %v1254_v21 = vsel %vm934_vm11, %v1957_v12, %v1948_v8  ;;  %1273 = vst.msk [vmem:[#allocation2 + $0x10] sm:$0xff] %vm71_vm5, %v1256_v16  ;;  %v1992_v17 = vsel %vm503_vm12, %v1951_v9, 128  ;;  %v2127_v16 = vld [vmem:[#allocation2 + $0x38] sm:$0xff] }
 0x1e4   :  { %v1986_v13 = vpop.xlane.xlu1 %457  ;;  %v1989_v14 = vsel %vm501_vm10, %v1951_v9, 128  ;;  %1271 = vst.msk [vmem:[#allocation2] sm:$0xff] %vm71_vm5, %v1254_v21  ;;  %2588 = vst [vmem:[#allocation19_spill] sm:$0xff] %v2127_v16 }
 0x1e5   :  { %vm488_vm0 = vcmp.le.f32.partialorder %v1753_v50, %v1986_v13  ;;  %v1997_v19 = vpop.xlane.xlu0 %453  ;;  %v534_v25 = vshra.s32 %v1989_v14, 16  ;;  %vm937_vm14 = vcmp.lt.f32.partialorder %v1986_v13, %v1984_v41  ;;  %v562_v50 = vshra.s32 %v1992_v17, 16 }
 0x1e6   :  { %vm486_vm1 = vcmp.le.f32.partialorder %v1765_v55, %v1997_v19  ;;  %vm504_vm10 = vmand %vm488_vm0, %vm406_vm2  ;;  %vm935_vm12 = vcmp.lt.f32.partialorder %v1997_v19, %v1976_v38  ;;  %v1257_v34 = vsel %vm937_vm14, %v1986_v13, %v1984_v41  ;;  %v2604_v13 = vld [vmem:[#allocation16_spill] sm:$0xff] }
 0x1e7   :  { %v2009_v27 = vcvt.s32.f32 %v534_v25  ;;  %vm502_vm15 = vmand %vm486_vm1, %vm404_vm3  ;;  %v2021_v32 = vsel %vm504_vm10, %v1951_v9, 128  ;;  %v1255_v31 = vsel %vm935_vm12, %v1997_v19, %v1976_v38  ;;  %1274 = vst.msk [vmem:[#allocation2 + $0x18] sm:$0xff] %vm71_vm5, %v1257_v34  ;;  %v2047_v40 = vcvt.s32.f32 %v562_v50 }
 0x1e8   :  { %v2018_v55 = vsel %vm502_vm15, %v1951_v9, 128  ;;  %1272 = vst.msk [vmem:[#allocation2 + $0x8] sm:$0xff] %vm71_vm5, %v1255_v31  ;;  %v576_v44 = vshra.s32 %v2021_v32, 16 }
 0x1e9   :  { %v2028_v33 = vpop.xlane.xlu0 %459  ;;  %537 = vmin.xlane.f32.xlu0 %v2009_v27  ;;  %v548_v35 = vshra.s32 %v2018_v55, 16 }
 0x1ea   :  { %vm489_vm2 = vcmp.le.f32.partialorder %v1799_v63, %v2028_v33  ;;  %vm938_vm3 = vcmp.lt.f32.partialorder %v2028_v33, %v2015_v29  ;;  %v2095_v18 = vcvt.s32.f32 %v576_v44 }
 0x1eb   :  { %v2045_v37 = vpop.xlane.xlu1 %461  ;;  %v2049_v42 = vcvt.s32.f32 %v548_v35  ;;  %vm505_vm0 = vmand %vm489_vm2, %vm407_vm4  ;;  %v1258_v63 = vsel %vm938_vm3, %v2028_v33, %v2015_v29  ;;  %v2154_v35 = vld [vmem:[#allocation2 + $0x58] sm:$0xff]  ;;  %v2607_v33 = vld [vmem:[#allocation19_spill] sm:$0xff] }
 0x1ec   :  { %vm490_vm1 = vcmp.le.f32.partialorder %v1812_v7, %v2045_v37  ;;  %v2065_v47 = vsel %vm505_vm0, %v1951_v9, 128  ;;  %1275 = vst.msk [vmem:[#allocation2 + $0x20] sm:$0xff] %vm71_vm5, %v1258_v63  ;;  %vm939_vm4 = vcmp.lt.f32.partialorder %v2045_v37, %v2038_v36 }
 0x1ed   :  { %v2070_v45 = vpop.xlane.xlu0 %463  ;;  %565 = vmin.xlane.f32.xlu0 %v2047_v40  ;;  %551 = vmin.xlane.f32.xlu1 %v2049_v42  ;;  %v590_v49 = vshra.s32 %v2065_v47, 16  ;;  %vm506_vm10 = vmand %vm490_vm1, %vm408_vm6  ;;  %v1259_v7 = vsel %vm939_vm4, %v2045_v37, %v2038_v36 }
 0x1ee   :  { %vm491_vm15 = vcmp.le.f32.partialorder %v1827_v15, %v2070_v45  ;;  %v2086_v52 = vsel %vm506_vm10, %v1951_v9, 128  ;;  %1276 = vst.msk [vmem:[#allocation2 + $0x28] sm:$0xff] %vm71_vm5, %v1259_v7  ;;  %vm2571_vm2 = vcmp.lt.f32.partialorder %v2070_v45, %v2060_v46 }
 0x1ef   :  { %v2091_v57 = vpop.xlane.xlu1 %465  ;;  %v2093_v51 = vcvt.s32.f32 %v590_v49  ;;  %vm507_vm6 = vmand %vm491_vm15, %vm409_vm7  ;;  %v604_v15 = vshra.s32 %v2086_v52, 16  ;;  %v1260_v60 = vsel %vm2571_vm2, %v2070_v45, %v2060_v46 }
 0x1f0   :  { %2586 = vst [vmem:[#allocation17_spill] sm:$0xff] %v2091_v57  ;;  %vm492_vm0 = vcmp.le.f32.partialorder %v1843_v26, %v2091_v57  ;;  %v2104_v59 = vsel %vm507_vm6, %v1951_v9, 128  ;;  %v2119_v26 = vld [vmem:[#allocation2 + $0x48] sm:$0xff]  ;;  %1277 = vst.msk [vmem:[#allocation2 + $0x30] sm:$0xff] %vm71_vm5, %v1260_v60 }
 0x1f1   :  { %v2111_v1 = vpop.xlane.xlu0 %467  ;;  %593 = vmin.xlane.f32.xlu0 %v2093_v51  ;;  %579 = vmin.xlane.f32.xlu1 %v2095_v18  ;;  %v618_v56 = vshra.s32 %v2104_v59, 16  ;;  %vm508_vm7 = vmand %vm492_vm0, %vm410_vm8  ;;  %v2133_v50 = vcvt.s32.f32 %v604_v15  ;;  %vm2565_vm0 = vcmp.lt.f32.partialorder %v2091_v57, %v2127_v16  ;;  %v2199_v15 = vld [vmem:[#allocation2 + $0x68] sm:$0xff] }
 0x1f2   :  { %2587 = vst [vmem:[#allocation18_spill] sm:$0xff] %v2111_v1  ;;  %vm493_vm1 = vcmp.le.f32.partialorder %v1868_v30, %v2111_v1  ;;  %v2125_v20 = vsel %vm508_vm7, %v1951_v9, 128 }
 0x1f3   :  { %v2129_v21 = vpop.xlane.xlu1 %469  ;;  %v2131_v25 = vcvt.s32.f32 %v618_v56  ;;  %vm509_vm8 = vmand %vm493_vm1, %vm411_vm9  ;;  %v632_v61 = vshra.s32 %v2125_v20, 16  ;;  %vm2590_vm9 = vcmp.eq.s32.totalorder %v1819_v11, %v1709_v24  ;;  %vm2591_vm1 = vcmp.eq.s32.totalorder %v1834_v22, %v1709_v24 }
 0x1f4   :  { %vm494_vm10 = vcmp.le.f32.partialorder %v1882_v43, %v2129_v21  ;;  %v2142_v30 = vsel %vm509_vm8, %v1951_v9, 128  ;;  %vm943_vm15 = vcmp.lt.f32.partialorder %v2129_v21, %v2119_v26  ;;  %v1261_v22 = vsel %vm2565_vm0, %v2091_v57, %v2127_v16  ;;  %v2265_v57 = vld [vmem:[#allocation2 + $0x50] sm:$0xff] }
 0x1f5   :  { %v2146_v31 = vpop.xlane.xlu0 %471  ;;  %621 = vmin.xlane.f32.xlu0 %v2131_v25  ;;  %607 = vmin.xlane.f32.xlu1 %v2133_v50  ;;  %v646_v4 = vshra.s32 %v2142_v30, 16  ;;  %vm510_vm6 = vmand %vm494_vm10, %vm2590_vm9  ;;  %v1263_v34 = vsel %vm943_vm15, %v2129_v21, %v2119_v26  ;;  %v2172_v63 = vcvt.s32.f32 %v632_v61  ;;  %1278 = vst.msk [vmem:[#allocation2 + $0x38] sm:$0xff] %vm71_vm5, %v1261_v22  ;;  %v2212_v61 = vld [vmem:[#allocation2 + $0x40] sm:$0xff] }
 0x1f6   :  { %2589 = vst [vmem:[#allocation20_spill] sm:$0xff] %v2146_v31  ;;  %vm495_vm7 = vcmp.le.f32.partialorder %v1897_v53, %v2146_v31  ;;  %v2161_v43 = vsel %vm510_vm6, %v1951_v9, 128  ;;  %1280 = vst.msk [vmem:[#allocation2 + $0x48] sm:$0xff] %vm71_vm5, %v1263_v34  ;;  %vm2593_vm6 = vcmp.eq.s32.totalorder %v1837_v23, %v1709_v24 }
 0x1f7   :  { %v2168_v44 = vpop.xlane.xlu1 %473  ;;  %v2170_v11 = vcvt.s32.f32 %v646_v4  ;;  %vm511_vm8 = vmand %vm495_vm7, %vm2591_vm1  ;;  %v660_v53 = vshra.s32 %v2161_v43, 16  ;;  %2594 = vst [vmem:[#allocation22_spill] sm:$0xff] %v2212_v61  ;;  %v2606_v29 = vld [vmem:[#allocation17_spill] sm:$0xff] }
 0x1f8   :  { %vm496_vm10 = vcmp.le.f32.partialorder %v1907_v58, %v2168_v44  ;;  %v2182_v49 = vsel %vm511_vm8, %v1951_v9, 128  ;;  %vm945_vm9 = vcmp.lt.f32.partialorder %v2168_v44, %v2154_v35  ;;  %vm2595_vm8 = vcmp.eq.s32.totalorder %v1876_v39, %v1709_v24  ;;  %2599 = vst [vmem:[#allocation24_spill] sm:$0xff] %v2265_v57 }
 0x1f9   :  { %649 = vmin.xlane.f32.xlu0 %v2170_v11  ;;  %v2192_v7 = vpop.xlane.xlu0 %475  ;;  %635 = vmin.xlane.f32.xlu1 %v2172_v63  ;;  %v674_v58 = vshra.s32 %v2182_v49, 16  ;;  %vm512_vm7 = vmand %vm496_vm10, %vm2593_vm6  ;;  %v1265_v56 = vsel %vm945_vm9, %v2168_v44, %v2154_v35  ;;  %v2218_v34 = vcvt.s32.f32 %v660_v53 }
 0x1fa   :  { %2592 = vst [vmem:[#allocation21_spill] sm:$0xff] %v2192_v7  ;;  %vm497_vm1 = vcmp.le.f32.partialorder %v1921_v0, %v2192_v7  ;;  %v2205_v60 = vsel %vm512_vm7, %v1951_v9, 128  ;;  %1282 = vst.msk [vmem:[#allocation2 + $0x58] sm:$0xff] %vm71_vm5, %v1265_v56 }
 0x1fb   :  { %v2214_v23 = vpop.xlane.xlu1 %477  ;;  %v2216_v4 = vcvt.s32.f32 %v674_v58  ;;  %vm513_vm10 = vmand %vm497_vm1, %vm2595_vm8  ;;  %v688_v0 = vshra.s32 %v2205_v60, 16  ;;  %vm2597_vm1 = vcmp.eq.s32.totalorder %v1890_v48, %v1709_v24  ;;  %v2240_v58 = vld [vmem:[#allocation2 + $0x78] sm:$0xff] }
 0x1fc   :  { %vm498_vm6 = vcmp.le.f32.partialorder %v1929_v2, %v2214_v23  ;;  %v2228_v22 = vsel %vm513_vm10, %v1951_v9, 128  ;;  %vm947_vm7 = vcmp.lt.f32.partialorder %v2214_v23, %v2199_v15  ;;  %vm942_vm10 = vcmp.lt.f32.partialorder %v2111_v1, %v2212_v61 }
 0x1fd   :  { %677 = vmin.xlane.f32.xlu0 %v2216_v4  ;;  %v2233_v53 = vpop.xlane.xlu0 %479  ;;  %663 = vmin.xlane.f32.xlu1 %v2218_v34  ;;  %v702_v39 = vshra.s32 %v2228_v22, 16  ;;  %vm514_vm8 = vmand %vm498_vm6, %vm2597_vm1  ;;  %v1267_v56 = vsel %vm947_vm7, %v2214_v23, %v2199_v15  ;;  %v2258_v16 = vcvt.s32.f32 %v688_v0  ;;  %vm2598_vm6 = vcmp.eq.s32.totalorder %v1900_v54, %v1709_v24 }
 0x1fe   :  { %2596 = vst [vmem:[#allocation23_spill] sm:$0xff] %v2233_v53  ;;  %vm499_vm0 = vcmp.le.f32.partialorder %v1935_v3, %v2233_v53  ;;  %v2247_v2 = vsel %vm514_vm8, %v1951_v9, 128  ;;  %1284 = vst.msk [vmem:[#allocation2 + $0x68] sm:$0xff] %vm71_vm5, %v1267_v56  ;;  %v1262_v54 = vsel %vm942_vm10, %v2111_v1, %v2212_v61  ;;  %v575_v1 = vand.u32 65535, %v2021_v32 }
 0x1ff   :  { %v2254_v28 = vpop.xlane.xlu1 %481  ;;  %v2256_v48 = vcvt.s32.f32 %v702_v39  ;;  %vm515_vm1 = vmand %vm499_vm0, %vm2598_vm6  ;;  %v716_v3 = vshra.s32 %v2247_v2, 16  ;;  %vm2600_vm0 = vcmp.eq.s32.totalorder %v1916_v62, %v1709_v24  ;;  %1279 = vst.msk [vmem:[#allocation2 + $0x40] sm:$0xff] %vm71_vm5, %v1262_v54  ;;  %v2288_v39 = vld [vmem:[#allocation2 + $0x70] sm:$0xff]  ;;  %v603_v32 = vand.u32 65535, %v2086_v52 }
 0x200   :  { %vm500_vm8 = vcmp.le.f32.partialorder %v1943_v5, %v2254_v28  ;;  %v2270_v46 = vsel %vm515_vm1, %v1951_v9, 128  ;;  %vm949_vm2 = vcmp.lt.f32.partialorder %v2254_v28, %v2240_v58  ;;  %v2286_v5 = vld [vmem:[#allocation2 + $0x60] sm:$0xff]  ;;  %2602 = vst [vmem:[#allocation26_spill] sm:$0xff] %v2288_v39  ;;  %vm944_vm1 = vcmp.lt.f32.partialorder %v2146_v31, %v2265_v57 }
 0x201   :  { %705 = vmin.xlane.f32.xlu0 %v2256_v48  ;;  %691 = vmin.xlane.f32.xlu1 %v2258_v16  ;;  %v730_v0 = vshra.s32 %v2270_v46, 16  ;;  %vm516_vm6 = vmand %vm500_vm8, %vm2600_vm0  ;;  %2601 = vst [vmem:[#allocation25_spill] sm:$0xff] %v2286_v5  ;;  %v1269_v61 = vsel %vm949_vm2, %v2254_v28, %v2240_v58  ;;  %v2302_v62 = vcvt.s32.f32 %v716_v3  ;;  %vm2583_vm8 = vcmp.lt.f32.partialorder %v2192_v7, %v2286_v5 }
 0x202   :  { %v2291_v56 = vsel %vm516_vm6, %v1951_v9, 128  ;;  %1286 = vst.msk [vmem:[#allocation2 + $0x78] sm:$0xff] %vm71_vm5, %v1269_v61  ;;  %v1264_v9 = vsel %vm944_vm1, %v2146_v31, %v2265_v57  ;;  %vm2582_vm0 = vcmp.lt.f32.partialorder %v2233_v53, %v2288_v39  ;;  %v1266_v61 = vsel %vm2583_vm8, %v2192_v7, %v2286_v5 }
 0x203   :  { %v2300_v24 = vcvt.s32.f32 %v730_v0  ;;  %v744_v54 = vshra.s32 %v2291_v56, 16  ;;  %1281 = vst.msk [vmem:[#allocation2 + $0x50] sm:$0xff] %vm71_vm5, %v1264_v9  ;;  %1283 = vst.msk [vmem:[#allocation2 + $0x60] sm:$0xff] %vm71_vm5, %v1266_v61  ;;  %v1268_v3 = vsel %vm2582_vm0, %v2233_v53, %v2288_v39  ;;  %v533_v9 = vand.u32 65535, %v1989_v14 }
 0x204   :  { %1285 = vst.msk [vmem:[#allocation2 + $0x70] sm:$0xff] %vm71_vm5, %v1268_v3  ;;  %v561_v5 = vand.u32 65535, %v1992_v17  ;;  %v547_v61 = vand.u32 65535, %v2018_v55  ;;  %v589_v14 = vand.u32 65535, %v2065_v47  ;;  %v617_v47 = vand.u32 65535, %v2104_v59 }
 0x205   :  { %733 = vmin.xlane.f32.xlu0 %v2300_v24  ;;  %719 = vmin.xlane.f32.xlu1 %v2302_v62  ;;  %v2329_v0 = vcvt.s32.f32 %v744_v54  ;;  %v535_v31 = vcvt.s32.f32 %v533_v9  ;;  %v645_v59 = vand.u32 65535, %v2142_v30  ;;  %v631_v52 = vand.u32 65535, %v2125_v20  ;;  %v2616_v58 = vld [vmem:[#allocation23_spill] sm:$0xff] }
 0x206   :  { %v563_v3 = vcvt.s32.f32 %v561_v5  ;;  %v549_v53 = vcvt.s32.f32 %v547_v61  ;;  %v577_v5 = vcvt.s32.f32 %v575_v1  ;;  %v619_v61 = vcvt.s32.f32 %v617_v47 }
 0x207   :  { %v605_v1 = vcvt.s32.f32 %v603_v32  ;;  %v673_v30 = vand.u32 65535, %v2182_v49  ;;  %v659_v20 = vand.u32 65535, %v2161_v43  ;;  %v701_v49 = vand.u32 65535, %v2228_v22 }
 0x208   :  { %v687_v43 = vand.u32 65535, %v2205_v60  ;;  %v729_v22 = vand.u32 65535, %v2270_v46  ;;  %v715_v60 = vand.u32 65535, %v2247_v2  ;;  %v743_v46 = vand.u32 65535, %v2291_v56  ;;  %v2614_v15 = vld [vmem:[#allocation25_spill] sm:$0xff] }
 0x209   :  { %747 = vmin.xlane.f32.xlu1 %v2329_v0  ;;  %v675_v47 = vcvt.s32.f32 %v673_v30  ;;  %v661_v32 = vcvt.s32.f32 %v659_v20  ;;  %v2603_v30 = vmov 0   ;;  %v2617_v20 = vld [vmem:[#allocation26_spill] sm:$0xff] }
 0x20a   :  { %v967_v56 = vsel %vm935_vm12, 1, %v2603_v30  ;;  %v969_v38 = vsel %vm937_vm14, 1, %v2603_v30  ;;  %v977_v8 = vsel %vm945_vm9, 1, %v2603_v30  ;;  %v970_v6 = vsel %vm938_vm3, 1, %v2603_v30 }
 0x20b   :  { %v979_v10 = vsel %vm947_vm7, 1, %v2603_v30  ;;  %v971_v12 = vsel %vm939_vm4, 1, %v2603_v30  ;;  %v981_v41 = vsel %vm949_vm2, 1, %v2603_v30  ;;  %v974_v21 = vsel %vm942_vm10, 1, %v2603_v30 }
 0x20c   :  { %v976_v44 = vsel %vm944_vm1, 1, %v2603_v30  ;;  %vm2618_vm14 = vcmp.lt.f32.partialorder %v2616_v58, %v2617_v20 }
 0x276   :  { %v2334_v57 = vpop.xlane.xlu0 %537 }
 0x277   :  { %vm539_vm6 = vcmp.eq.f32.partialorder %v2009_v27, %v2334_v57 }
 0x278   :  { %v540_v7 = vsel %vm539_vm6, %v535_v31, inf }
 0x279   :  { %541 = vmin.xlane.f32.xlu0 %v540_v7  ;;  %v591_v7 = vcvt.s32.f32 %v589_v14 }
 0x27a   :  { %v2340_v54 = vpop.xlane.xlu0 %565  ;;  %v2342_v39 = vpop.xlane.xlu1 %551 }
 0x27b   :  { %vm567_vm5 = vcmp.eq.f32.partialorder %v2047_v40, %v2340_v54  ;;  %vm553_vm0 = vcmp.eq.f32.partialorder %v2049_v42, %v2342_v39 }
 0x27c   :  { %v568_v17 = vsel %vm567_vm5, %v563_v3, inf  ;;  %v554_v27 = vsel %vm553_vm0, %v549_v53, inf }
 0x27d   :  { %569 = vmin.xlane.f32.xlu0 %v568_v17  ;;  %555 = vmin.xlane.f32.xlu1 %v554_v27  ;;  %v647_v17 = vcvt.s32.f32 %v645_v59  ;;  %v633_v27 = vcvt.s32.f32 %v631_v52 }
 0x27e   :  { %v2350_v55 = vpop.xlane.xlu0 %593  ;;  %v2352_v31 = vpop.xlane.xlu1 %579 }
 0x27f   :  { %vm595_vm6 = vcmp.eq.f32.partialorder %v2093_v51, %v2350_v55  ;;  %vm581_vm8 = vcmp.eq.f32.partialorder %v2095_v18, %v2352_v31 }
 0x280   :  { %v596_v40 = vsel %vm595_vm6, %v591_v7, inf  ;;  %v582_v42 = vsel %vm581_vm8, %v577_v5, inf }
 0x281   :  { %597 = vmin.xlane.f32.xlu0 %v596_v40  ;;  %583 = vmin.xlane.f32.xlu1 %v582_v42 }
 0x282   :  { %v2360_v53 = vpop.xlane.xlu0 %621  ;;  %v2362_v9 = vpop.xlane.xlu1 %607 }
 0x283   :  { %vm623_vm0 = vcmp.eq.f32.partialorder %v2131_v25, %v2360_v53  ;;  %vm609_vm5 = vcmp.eq.f32.partialorder %v2133_v50, %v2362_v9 }
 0x284   :  { %v624_v51 = vsel %vm623_vm0, %v619_v61, inf  ;;  %v610_v18 = vsel %vm609_vm5, %v605_v1, inf  ;;  %v703_v61 = vcvt.s32.f32 %v701_v49  ;;  %v689_v1 = vcvt.s32.f32 %v687_v43 }
 0x285   :  { %625 = vmin.xlane.f32.xlu0 %v624_v51  ;;  %611 = vmin.xlane.f32.xlu1 %v610_v18  ;;  %v731_v51 = vcvt.s32.f32 %v729_v22  ;;  %v717_v18 = vcvt.s32.f32 %v715_v60 }
 0x286   :  { %v2370_v3 = vpop.xlane.xlu0 %649  ;;  %v2372_v14 = vpop.xlane.xlu1 %635 }
 0x287   :  { %vm651_vm8 = vcmp.eq.f32.partialorder %v2170_v11, %v2370_v3  ;;  %vm637_vm6 = vcmp.eq.f32.partialorder %v2172_v63, %v2372_v14 }
 0x288   :  { %v652_v25 = vsel %vm651_vm8, %v647_v17, inf  ;;  %v638_v50 = vsel %vm637_vm6, %v633_v27, inf  ;;  %v745_v17 = vcvt.s32.f32 %v743_v46 }
 0x289   :  { %653 = vmin.xlane.f32.xlu0 %v652_v25  ;;  %639 = vmin.xlane.f32.xlu1 %v638_v50  ;;  %v980_v25 = vsel %vm2618_vm14, 1, %v2603_v30  ;;  %v544_v50 = vcvt.f32.s32 %v2334_v57 }
 0x28a   :  { %v2380_v7 = vpop.xlane.xlu0 %677  ;;  %v2382_v5 = vpop.xlane.xlu1 %663 }
 0x28b   :  { %vm679_vm0 = vcmp.eq.f32.partialorder %v2216_v4, %v2380_v7  ;;  %vm665_vm5 = vcmp.eq.f32.partialorder %v2218_v34, %v2382_v5  ;;  %v545_v43 = vshll.u32 %v544_v50, 16 }
 0x28c   :  { %v680_v11 = vsel %vm679_vm0, %v675_v47, inf  ;;  %v666_v63 = vsel %vm665_vm5, %v661_v32, inf  ;;  %v558_v32 = vcvt.f32.s32 %v2342_v39 }
 0x28d   :  { %681 = vmin.xlane.f32.xlu0 %v680_v11  ;;  %667 = vmin.xlane.f32.xlu1 %v666_v63  ;;  %v572_v11 = vcvt.f32.s32 %v2340_v54  ;;  %v586_v63 = vcvt.f32.s32 %v2352_v31 }
 0x28e   :  { %v2390_v40 = vpop.xlane.xlu0 %705  ;;  %v2392_v42 = vpop.xlane.xlu1 %691  ;;  %v559_v60 = vshll.u32 %v558_v32, 16 }
 0x28f   :  { %vm707_vm8 = vcmp.eq.f32.partialorder %v2256_v48, %v2390_v40  ;;  %vm693_vm6 = vcmp.eq.f32.partialorder %v2258_v16, %v2392_v42  ;;  %v587_v57 = vshll.u32 %v586_v63, 16 }
 0x290   :  { %v708_v4 = vsel %vm707_vm8, %v703_v61, inf  ;;  %v694_v34 = vsel %vm693_vm6, %v689_v1, inf }
 0x291   :  { %709 = vmin.xlane.f32.xlu0 %v708_v4  ;;  %695 = vmin.xlane.f32.xlu1 %v694_v34 }
 0x292   :  { %v2400_v59 = vpop.xlane.xlu0 %733  ;;  %v2402_v52 = vpop.xlane.xlu1 %719 }
 0x293   :  { %vm735_vm0 = vcmp.eq.f32.partialorder %v2300_v24, %v2400_v59  ;;  %vm721_vm5 = vcmp.eq.f32.partialorder %v2302_v62, %v2402_v52  ;;  %v966_v24 = vsel %vm934_vm11, 1, %v2603_v30  ;;  %v968_v62 = vsel %vm936_vm13, 1, %v2603_v30 }
 0x294   :  { %v736_v2 = vsel %vm735_vm0, %v731_v51, inf  ;;  %v722_v16 = vsel %vm721_vm5, %v717_v18, inf  ;;  %vm2605_vm11 = vcmp.lt.f32.partialorder %v2070_v45, %v2604_v13  ;;  %vm2608_vm13 = vcmp.lt.f32.partialorder %v2606_v29, %v2607_v33  ;;  %v2613_v45 = vld [vmem:[#allocation21_spill] sm:$0xff] }
 0x295   :  { %737 = vmin.xlane.f32.xlu0 %v736_v2  ;;  %723 = vmin.xlane.f32.xlu1 %v722_v16  ;;  %v972_v19 = vsel %vm2605_vm11, 1, %v2603_v30  ;;  %v973_v26 = vsel %vm2608_vm13, 1, %v2603_v30  ;;  %vm2615_vm12 = vcmp.lt.f32.partialorder %v2613_v45, %v2614_v15  ;;  %v600_v51 = vcvt.f32.s32 %v2350_v55 }
 0x296   :  { %v2409_v48 = vpop.xlane.xlu1 %747  ;;  %v978_v23 = vsel %vm2615_vm12, 1, %v2603_v30  ;;  %v573_v18 = vshll.u32 %v572_v11, 16  ;;  %v614_v2 = vcvt.f32.s32 %v2362_v9  ;;  %v1618_v55 = vmov 1.0|1.0  }
 0x297   :  { %vm749_vm8 = vcmp.eq.f32.partialorder %v2329_v0, %v2409_v48  ;;  %v975_v0 = vsel %vm943_vm15, 1, %v2603_v30  ;;  %v642_v9 = vcvt.f32.s32 %v2372_v14  ;;  %v670_v29 = vcvt.f32.s32 %v2382_v5 }
 0x298   :  { %v750_v27 = vsel %vm749_vm8, %v745_v17, inf  ;;  %v2619_v17 = vld [vmem:[#allocation15_spill] sm:$0xff] }
 0x299   :  { %751 = vmin.xlane.f32.xlu1 %v750_v27  ;;  %v671_v35 = vshll.u32 %v670_v29, 16 }
 0x2aa   :  { %986 = vperm.xlu1 %1492, %v967_v56   ;;  %v601_v56 = vshll.u32 %v600_v51, 16 }
 0x2ab   :  { %983 = vperm.xlu0 %1491, %v966_v24   ;;  %v628_v24 = vcvt.f32.s32 %v2360_v53 }
 0x2ad   :  { %v629_v53 = vshll.u32 %v628_v24, 16 }
 0x2ae   :  { %989 = vperm.xlu1 %1492, %v968_v62  }
 0x2af   :  { %1010 = vperm.xlu0 %1491, %v975_v0   ;;  %v615_v0 = vshll.u32 %v614_v2, 16 }
 0x2b2   :  { %992 = vperm.xlu1 %1492, %v969_v38  }
 0x2b3   :  { %1016 = vperm.xlu0 %1491, %v977_v8  }
 0x2b6   :  { %995 = vperm.xlu1 %1492, %v970_v6  }
 0x2b7   :  { %1022 = vperm.xlu0 %1491, %v979_v10  }
 0x2ba   :  { %998 = vperm.xlu1 %1492, %v971_v12  }
 0x2bb   :  { %1028 = vperm.xlu0 %1491, %v981_v41   ;;  %v656_v41 = vcvt.f32.s32 %v2370_v3  ;;  %v684_v3 = vcvt.f32.s32 %v2380_v7 }
 0x2bd   :  { %v685_v20 = vshll.u32 %v684_v3, 16 }
 0x2be   :  { %1001 = vperm.xlu1 %1492, %v972_v19   ;;  %v643_v19 = vshll.u32 %v642_v9, 16 }
 0x2c2   :  { %1004 = vperm.xlu1 %1492, %v973_v26  }
 0x2c6   :  { %1007 = vperm.xlu1 %1492, %v974_v21   ;;  %v657_v21 = vshll.u32 %v656_v41, 16 }
 0x2ca   :  { %1013 = vperm.xlu1 %1492, %v976_v44   ;;  %v698_v44 = vcvt.f32.s32 %v2392_v42 }
 0x2cc   :  { %v699_v50 = vshll.u32 %v698_v44, 16 }
 0x2ce   :  { %1019 = vperm.xlu1 %1492, %v978_v23  }
 0x2d2   :  { %1025 = vperm.xlu1 %1492, %v980_v25   ;;  %v712_v25 = vcvt.f32.s32 %v2390_v40  ;;  %v740_v40 = vcvt.f32.s32 %v2400_v59 }
 0x2d4   :  { %v713_v63 = vshll.u32 %v712_v25, 16 }
 0x306   :  { %v542_v47 = vpop.xlane.xlu0 %541 }
 0x307   :  { %v543_v49 = vcvt.f32.s32 %v542_v47  ;;  %v726_v47 = vcvt.f32.s32 %v2402_v52 }
 0x309   :  { %v546_v61 = vadd.s32 %v545_v43, %v543_v49 }
 0x30a   :  { %v570_v1 = vpop.xlane.xlu0 %569  ;;  %v556_v22 = vpop.xlane.xlu1 %555 }
 0x30b   :  { %v571_v4 = vcvt.f32.s32 %v570_v1  ;;  %v557_v34 = vcvt.f32.s32 %v556_v22  ;;  %vm757_vm3 = vcmp.eq.s32.totalorder %v2619_v17, %v546_v61  ;;  %v727_v1 = vshll.u32 %v726_v47, 16 }
 0x30c   :  { %v754_v22 = vcvt.f32.s32 %v2409_v48 }
 0x30d   :  { %v560_v46 = vadd.s32 %v559_v60, %v557_v34  ;;  %v574_v54 = vadd.s32 %v573_v18, %v571_v4 }
 0x30e   :  { %v598_v39 = vpop.xlane.xlu0 %597  ;;  %v584_v16 = vpop.xlane.xlu1 %583  ;;  %v755_v2 = vshll.u32 %v754_v22, 16 }
 0x30f   :  { %v599_v27 = vcvt.f32.s32 %v598_v39  ;;  %v585_v31 = vcvt.f32.s32 %v584_v16  ;;  %vm758_vm4 = vcmp.eq.s32.totalorder %v2619_v17, %v560_v46  ;;  %vm759_vm15 = vcmp.eq.s32.totalorder %v2619_v17, %v574_v54 }
 0x310   :  { %vm1338_vm2 = vmpackc.low %vm758_vm4, %vm757_vm3  ;;  %v741_v46 = vshll.u32 %v740_v40, 16 }
 0x311   :  { %v588_v62 = vadd.s32 %v587_v57, %v585_v31  ;;  %1466 = vmatprep.mubr.msk.bf16.mxu1 %vm1338_vm2, %v1618_v55  ;;  %v602_v38 = vadd.s32 %v601_v56, %v599_v27 }
 0x312   :  { %v626_v8 = vpop.xlane.xlu0 %625  ;;  %v612_v6 = vpop.xlane.xlu1 %611 }
 0x313   :  { %v627_v10 = vcvt.f32.s32 %v626_v8  ;;  %v613_v12 = vcvt.f32.s32 %v612_v6  ;;  %vm760_vm9 = vcmp.eq.s32.totalorder %v2619_v17, %v588_v62  ;;  %vm761_vm10 = vcmp.eq.s32.totalorder %v2619_v17, %v602_v38 }
 0x314   :  { %vm1340_vm7 = vmpackc.low %vm760_vm9, %vm759_vm15 }
 0x315   :  { %v616_v13 = vadd.s32 %v615_v0, %v613_v12  ;;  %1467 = vmatmul.mubr.msk.bf16.vlgmr.msra.gmra.mrb[0].mxu1 %vm1340_vm7, %v1618_v55  ;;  %v630_v26 = vadd.s32 %v629_v53, %v627_v10 }
 0x316   :  { %v654_v14 = vpop.xlane.xlu0 %653  ;;  %v640_v33 = vpop.xlane.xlu1 %639 }
 0x317   :  { %v655_v36 = vcvt.f32.s32 %v654_v14  ;;  %v641_v37 = vcvt.f32.s32 %v640_v33  ;;  %vm762_vm1 = vcmp.eq.s32.totalorder %v2619_v17, %v616_v13  ;;  %vm763_vm0 = vcmp.eq.s32.totalorder %v2619_v17, %v630_v26  ;;  %v1509_v13 = vld [vmem:[#allocation11 + $0x8] sm:$0xff]   ;;  %v1510_v14 = vld [vmem:[#allocation11] sm:$0xff]  }
 0x318   :  { %vm1342_vm6 = vmpackc.low %vm762_vm1, %vm761_vm10 }
 0x319   :  { %v644_v28 = vadd.s32 %v643_v19, %v641_v37  ;;  %1470 = vmatprep.mubr.msk.bf16.mxu1 %vm1342_vm6, %v1618_v55  ;;  %v658_v5 = vadd.s32 %v657_v21, %v655_v36 }
 0x31a   :  { %v682_v45 = vpop.xlane.xlu0 %681  ;;  %v668_v15 = vpop.xlane.xlu1 %667 }
 0x31b   :  { %v683_v23 = vcvt.f32.s32 %v682_v45  ;;  %v669_v58 = vcvt.f32.s32 %v668_v15  ;;  %vm764_vm5 = vcmp.eq.s32.totalorder %v2619_v17, %v644_v28  ;;  %vm765_vm11 = vcmp.eq.s32.totalorder %v2619_v17, %v658_v5 }
 0x31c   :  { %vm1344_vm8 = vmpackc.low %vm764_vm5, %vm763_vm0 }
 0x31d   :  { %v672_v7 = vadd.s32 %v671_v35, %v669_v58  ;;  %1471 = vmatmul.mubr.msk.bf16.gmra.mrb[4].mxu1 %vm1344_vm8, %v1618_v55  ;;  %v686_v49 = vadd.s32 %v685_v20, %v683_v23 }
 0x31e   :  { %v710_v42 = vpop.xlane.xlu0 %709  ;;  %v696_v32 = vpop.xlane.xlu1 %695 }
 0x31f   :  { %v711_v43 = vcvt.f32.s32 %v710_v42  ;;  %v697_v11 = vcvt.f32.s32 %v696_v32  ;;  %vm766_vm13 = vcmp.eq.s32.totalorder %v2619_v17, %v672_v7  ;;  %vm767_vm14 = vcmp.eq.s32.totalorder %v2619_v17, %v686_v49  ;;  %v1511_v42 = vld [vmem:[#allocation11 + $0x18] sm:$0xff]  }
 0x320   :  { %vm1346_vm12 = vmpackc.low %vm766_vm13, %vm765_vm11 }
 0x321   :  { %v700_v61 = vadd.s32 %v699_v50, %v697_v11  ;;  %1474 = vmatprep.mubr.msk.bf16.mxu1 %vm1346_vm12, %v1618_v55  ;;  %v714_v4 = vadd.s32 %v713_v63, %v711_v43  ;;  %v1512_v43 = vld [vmem:[#allocation11 + $0x10] sm:$0xff]  }
 0x322   :  { %v738_v52 = vpop.xlane.xlu0 %737  ;;  %v724_v60 = vpop.xlane.xlu1 %723 }
 0x323   :  { %v725_v34 = vcvt.f32.s32 %v724_v60  ;;  %vm768_vm3 = vcmp.eq.s32.totalorder %v2619_v17, %v700_v61  ;;  %v739_v51 = vcvt.f32.s32 %v738_v52  ;;  %vm769_vm2 = vcmp.eq.s32.totalorder %v2619_v17, %v714_v4 }
 0x324   :  { %vm1348_vm4 = vmpackc.low %vm768_vm3, %vm767_vm14 }
 0x325   :  { %v728_v18 = vadd.s32 %v727_v1, %v725_v34  ;;  %1475 = vmatmul.mubr.msk.bf16.gmra.mrb[8].mxu1 %vm1348_vm4, %v1618_v55  ;;  %v742_v48 = vadd.s32 %v741_v46, %v739_v51 }
 0x326   :  { %v752_v57 = vpop.xlane.xlu1 %751 }
 0x327   :  { %v753_v59 = vcvt.f32.s32 %v752_v57  ;;  %vm770_vm15 = vcmp.eq.s32.totalorder %v2619_v17, %v728_v18  ;;  %vm771_vm10 = vcmp.eq.s32.totalorder %v2619_v17, %v742_v48 }
 0x328   :  { %vm1350_vm9 = vmpackc.low %vm770_vm15, %vm769_vm2 }
 0x329   :  { %v756_v39 = vadd.s32 %v755_v2, %v753_v59  ;;  %1478 = vmatprep.mubr.msk.bf16.mxu1 %vm1350_vm9, %v1618_v55 }
 0x32a   :  { %v987_v16 = vpop.permute.xlu1 %986  ;;  %v984_v62 = vpop.permute.xlu0 %983 }
 0x32b   :  { %vm772_vm7 = vcmp.eq.s32.totalorder %v2619_v17, %v756_v39  ;;  %vm1031_vm6 = vcmp.eq.s32.totalorder %v987_v16, 1  ;;  %vm1030_vm5 = vcmp.eq.s32.totalorder %v984_v62, 1 }
 0x32c   :  { %vm1352_vm1 = vmpackc.low %vm772_vm7, %vm771_vm10 }
 0x32d   :  { %1479 = vmatmul.mubr.msk.bf16.gmra.mrb[12].mxu1 %vm1352_vm1, %v1618_v55  ;;  %vm1047_vm8 = vmpackc.low %vm1031_vm6, %vm1031_vm6 }
 0x32e   :  { %v990_v54 = vpop.permute.xlu1 %989  ;;  %vm1046_vm12 = vmpackc.low %vm1030_vm5, %vm1030_vm5  ;;  %v1063_v55 = vsel %vm1047_vm8, 65537, %v2603_v30  ;;  %v1011_v8 = vpop.permute.xlu0 %1010 }
 0x32f   :  { %vm1032_vm11 = vcmp.eq.s32.totalorder %v990_v54, 1  ;;  %v1062_v38 = vsel %vm1046_vm12, 65537, %v2603_v30  ;;  %v1513_v54 = vld [vmem:[#allocation11 + $0x28] sm:$0xff]  }
 0x330   :  { %vm1048_vm14 = vmpackc.low %vm1032_vm11, %vm1032_vm11  ;;  %v1354_v41 = vcombine.low %v1062_v38, %v1063_v55 }
 0x331   :  { %v1064_v6 = vsel %vm1048_vm14, 65537, %v2603_v30 }
 0x332   :  { %v993_v27 = vpop.permute.xlu1 %992  ;;  %v1017_v36 = vpop.permute.xlu0 %1016  ;;  %vm1102_vm6 = vcmp.ne.s16.totalorder %v1354_v41, 0 }
 0x333   :  { %vm1033_vm0 = vcmp.eq.s32.totalorder %v993_v27, 1  ;;  %vm1041_vm11 = vcmp.eq.s32.totalorder %v1017_v36, 1 }
 0x334   :  { %vm1049_vm13 = vmpackc.low %vm1033_vm0, %vm1033_vm0 }
 0x335   :  { %v1065_v9 = vsel %vm1049_vm13, 65537, %v2603_v30  ;;  %vm1039_vm13 = vcmp.eq.s32.totalorder %v1011_v8, 1 }
 0x336   :  { %v996_v31 = vpop.permute.xlu1 %995  ;;  %v1355_v10 = vcombine.low %v1064_v6, %v1065_v9  ;;  %v1023_v32 = vpop.permute.xlu0 %1022 }
 0x337   :  { %vm1034_vm15 = vcmp.eq.s32.totalorder %v996_v31, 1  ;;  %v1514_v31 = vld [vmem:[#allocation11 + $0x20] sm:$0xff]  }
 0x338   :  { %vm1103_vm10 = vcmp.ne.s16.totalorder %v1355_v10, 0  ;;  %vm1050_vm0 = vmpackc.low %vm1034_vm15, %vm1034_vm15 }
 0x339   :  { %v1066_v58 = vsel %vm1050_vm0, 65537, %v2603_v30 }
 0x33a   :  { %v999_v56 = vpop.permute.xlu1 %998  ;;  %v1029_v2 = vpop.permute.xlu0 %1028 }
 0x33b   :  { %vm1035_vm4 = vcmp.eq.s32.totalorder %v999_v56, 1 }
 0x33c   :  { %vm1051_vm7 = vmpackc.low %vm1035_vm4, %vm1035_vm4 }
 0x33d   :  { %v1067_v28 = vsel %vm1051_vm7, 65537, %v2603_v30 }
 0x33e   :  { %v1002_v24 = vpop.permute.xlu1 %1001  ;;  %v1356_v50 = vcombine.low %v1066_v58, %v1067_v28 }
 0x33f   :  { %vm1036_vm2 = vcmp.eq.s32.totalorder %v1002_v24, 1 }
 0x340   :  { %vm1052_vm1 = vmpackc.low %vm1036_vm2, %vm1036_vm2  ;;  %vm1104_vm15 = vcmp.ne.s16.totalorder %v1356_v50, 0 }
 0x341   :  { %v1068_v45 = vsel %vm1052_vm1, 65537, %v2603_v30  ;;  %vm1055_vm2 = vmpackc.low %vm1039_vm13, %vm1039_vm13  ;;  %vm1043_vm1 = vcmp.eq.s32.totalorder %v1023_v32, 1 }
 0x342   :  { %v1005_v0 = vpop.permute.xlu1 %1004  ;;  %v1071_v57 = vsel %vm1055_vm2, 65537, %v2603_v30  ;;  %vm1059_vm13 = vmpackc.low %vm1043_vm1, %vm1043_vm1 }
 0x343   :  { %vm1037_vm3 = vcmp.eq.s32.totalorder %v1005_v0, 1  ;;  %v1075_v41 = vsel %vm1059_vm13, 65537, %v2603_v30 }
 0x344   :  { %vm1053_vm9 = vmpackc.low %vm1037_vm3, %vm1037_vm3 }
 0x345   :  { %v1069_v21 = vsel %vm1053_vm9, 65537, %v2603_v30  ;;  %vm1057_vm3 = vmpackc.low %vm1041_vm11, %vm1041_vm11 }
 0x346   :  { %v1008_v17 = vpop.permute.xlu1 %1007  ;;  %v1357_v20 = vcombine.low %v1068_v45, %v1069_v21  ;;  %v1073_v51 = vsel %vm1057_vm3, 65537, %v2603_v30 }
 0x347   :  { %vm1038_vm8 = vcmp.eq.s32.totalorder %v1008_v17, 1 }
 0x348   :  { %vm1054_vm14 = vmpackc.low %vm1038_vm8, %vm1038_vm8  ;;  %vm1105_vm4 = vcmp.ne.s16.totalorder %v1357_v20, 0 }
 0x349   :  { %v1070_v22 = vsel %vm1054_vm14, 65537, %v2603_v30 }
 0x34a   :  { %v1014_v19 = vpop.permute.xlu1 %1013  ;;  %v1358_v39 = vcombine.low %v1070_v22, %v1071_v57 }
 0x34b   :  { %vm1040_vm5 = vcmp.eq.s32.totalorder %v1014_v19, 1 }
 0x34c   :  { %vm1056_vm12 = vmpackc.low %vm1040_vm5, %vm1040_vm5  ;;  %vm1106_vm5 = vcmp.ne.s16.totalorder %v1358_v39, 0 }
 0x34d   :  { %v1072_v40 = vsel %vm1056_vm12, 65537, %v2603_v30 }
 0x34e   :  { %v1020_v25 = vpop.permute.xlu1 %1019  ;;  %v1359_v59 = vcombine.low %v1072_v40, %v1073_v51 }
 0x34f   :  { %vm1042_vm7 = vcmp.eq.s32.totalorder %v1020_v25, 1 }
 0x350   :  { %vm1058_vm8 = vmpackc.low %vm1042_vm7, %vm1042_vm7 }
 0x351   :  { %v1074_v10 = vsel %vm1058_vm8, 65537, %v2603_v30 }
 0x352   :  { %v1026_v52 = vpop.permute.xlu1 %1025  ;;  %v1360_v19 = vcombine.low %v1074_v10, %v1075_v41 }
 0x353   :  { %vm1044_vm9 = vcmp.eq.s32.totalorder %v1026_v52, 1 }
 0x354   :  { %vm1060_vm0 = vmpackc.low %vm1044_vm9, %vm1044_vm9  ;;  %vm1108_vm14 = vcmp.ne.s16.totalorder %v1360_v19, 0 }
 0x355   :  { %v1076_v38 = vsel %vm1060_vm0, 65537, %v2603_v30 }
 0x3e8   :  { %v1468_v12 = vpop.f32.mrb[0].mxu1 }
 0x3e9   :  { %v847_v53 = vpop.f32.mrb[1].mxu1 }
 0x3ea   :  { %v1469_v29 = vpop.f32.mrb[2].mxu1 }
 0x3eb   :  { %v911_v33 = vpack.c.bf16 %v1469_v29, %v1468_v12  ;;  %v850_v26 = vpop.f32.mrb[3].mxu1 }
 0x3ec   :  { %v910_v37 = vpack.c.bf16 %v850_v26, %v847_v53  ;;  %v1516_v26 = vld [vmem:[#allocation11 + $0x30] sm:$0xff]  }
 0x3ed   :  { %v1159_v3 = vsel %vm1103_vm10, %v911_v33, %v1509_v13  ;;  %vm1045_vm10 = vcmp.eq.s32.totalorder %v1029_v2, 1 }
 0x3ee   :  { %v1372_v35 = vcombine.low %v1159_v3, %v1159_v3  ;;  %v1373_v44 = vcombine.high %v1159_v3, %v1159_v3  ;;  %v1158_v5 = vsel %vm1102_vm6, %v910_v37, %v1510_v14  ;;  %vm1107_vm6 = vcmp.ne.s16.totalorder %v1359_v59, 0  ;;  %vm1061_vm11 = vmpackc.low %vm1045_vm10, %vm1045_vm10  ;;  %v1515_v14 = vld [vmem:[#allocation11 + $0x38] sm:$0xff]  }
 0x3ef   :  { %v1370_v15 = vcombine.low %v1158_v5, %v1158_v5  ;;  %v1371_v23 = vcombine.high %v1158_v5, %v1158_v5  ;;  %v1077_v12 = vsel %vm1061_vm11, 65537, %v2603_v30 }
 0x3f0   :  { %1224 = vst [vmem:[#allocation11 + $0x8] sm:$0xf] %v1372_v35  ;;  %1225 = vst [vmem:[#allocation11 + $0xc] sm:$0xf] %v1373_v44  ;;  %v1472_v7 = vpop.f32.mrb[4].mxu1  ;;  %v1361_v53 = vcombine.low %v1076_v38, %v1077_v12 }
 0x3f1   :  { %1222 = vst [vmem:[#allocation11] sm:$0xf] %v1370_v15  ;;  %1223 = vst [vmem:[#allocation11 + $0x4] sm:$0xf] %v1371_v23  ;;  %v863_v47 = vpop.f32.mrb[5].mxu1 }
 0x3f2   :  { %v1473_v49 = vpop.f32.mrb[6].mxu1  ;;  %vm1109_vm12 = vcmp.ne.s16.totalorder %v1361_v53, 0 }
 0x3f3   :  { %v913_v11 = vpack.c.bf16 %v1473_v49, %v1472_v7  ;;  %v866_v63 = vpop.f32.mrb[7].mxu1 }
 0x3f4   :  { %v912_v61 = vpack.c.bf16 %v866_v63, %v863_v47 }
 0x3f5   :  { %v1161_v1 = vsel %vm1105_vm4, %v913_v11, %v1511_v42 }
 0x3f6   :  { %v1376_v60 = vcombine.low %v1161_v1, %v1161_v1  ;;  %v1377_v4 = vcombine.high %v1161_v1, %v1161_v1  ;;  %v1160_v34 = vsel %vm1104_vm15, %v912_v61, %v1512_v43 }
 0x3f7   :  { %v1374_v18 = vcombine.low %v1160_v34, %v1160_v34  ;;  %v1375_v46 = vcombine.high %v1160_v34, %v1160_v34 }
 0x3f8   :  { %1228 = vst [vmem:[#allocation11 + $0x18] sm:$0xf] %v1376_v60  ;;  %1229 = vst [vmem:[#allocation11 + $0x1c] sm:$0xf] %v1377_v4  ;;  %v1476_v48 = vpop.f32.mrb[8].mxu1 }
 0x3f9   :  { %1226 = vst [vmem:[#allocation11 + $0x10] sm:$0xf] %v1374_v18  ;;  %1227 = vst [vmem:[#allocation11 + $0x14] sm:$0xf] %v1375_v46  ;;  %v879_v16 = vpop.f32.mrb[9].mxu1 }
 0x3fa   :  { %v1477_v27 = vpop.f32.mrb[10].mxu1 }
 0x3fb   :  { %v915_v56 = vpack.c.bf16 %v1477_v27, %v1476_v48  ;;  %v882_v24 = vpop.f32.mrb[11].mxu1 }
 0x3fc   :  { %v914_v62 = vpack.c.bf16 %v882_v24, %v879_v16 }
 0x3fd   :  { %v1163_v0 = vsel %vm1107_vm6, %v915_v56, %v1513_v54 }
 0x3fe   :  { %v1380_v17 = vcombine.low %v1163_v0, %v1163_v0  ;;  %v1381_v9 = vcombine.high %v1163_v0, %v1163_v0  ;;  %v1162_v55 = vsel %vm1106_vm5, %v914_v62, %v1514_v31 }
 0x3ff   :  { %v1378_v8 = vcombine.low %v1162_v55, %v1162_v55  ;;  %v1379_v6 = vcombine.high %v1162_v55, %v1162_v55 }
 0x400   :  { %1232 = vst [vmem:[#allocation11 + $0x28] sm:$0xf] %v1380_v17  ;;  %1233 = vst [vmem:[#allocation11 + $0x2c] sm:$0xf] %v1381_v9  ;;  %v1480_v13 = vpop.f32.mrb[12].mxu1 }
 0x401   :  { %1230 = vst [vmem:[#allocation11 + $0x20] sm:$0xf] %v1378_v8  ;;  %1231 = vst [vmem:[#allocation11 + $0x24] sm:$0xf] %v1379_v6  ;;  %v895_v29 = vpop.f32.mrb[13].mxu1 }
 0x402   :  { %v1481_v33 = vpop.f32.mrb[14].mxu1 }
 0x403   :  { %v917_v36 = vpack.c.bf16 %v1481_v33, %v1480_v13  ;;  %v898_v37 = vpop.f32.mrb[15].mxu1 }
 0x404   :  { %v916_v21 = vpack.c.bf16 %v898_v37, %v895_v29 }
 0x405   :  { %v1165_v3 = vsel %vm1109_vm12, %v917_v36, %v1515_v14 }
 0x406   :  { %v1384_v28 = vcombine.low %v1165_v3, %v1165_v3  ;;  %v1385_v35 = vcombine.high %v1165_v3, %v1165_v3  ;;  %v1164_v44 = vsel %vm1108_vm14, %v916_v21, %v1516_v26 }
 0x407   :  { %v1382_v5 = vcombine.low %v1164_v44, %v1164_v44  ;;  %v1383_v30 = vcombine.high %v1164_v44, %v1164_v44 }
 0x408   :  { %1236 = vst [vmem:[#allocation11 + $0x38] sm:$0xf] %v1384_v28  ;;  %1237 = vst [vmem:[#allocation11 + $0x3c] sm:$0xf] %v1385_v35 }
 0x409   :  { %1234 = vst [vmem:[#allocation11 + $0x30] sm:$0xf] %v1382_v5  ;;  %1235 = vst [vmem:[#allocation11 + $0x34] sm:$0xf] %v1383_v30 }
 0x40a   :  { %1594 = shalt.err (!%p1591_p0)
}
 0x40b   :  { %s1595_s13 = scalar_lea.hbm %s2557_s5, 1024 }
 0x40c   :  { %p1596_p1 = scmp.ne.s32.totalorder %s2557_s5, %s1595_s13  ;;  %p1599_p2 = scmp.lt.u32.totalorder %s1595_s13, %s2557_s5 }
 0x40e   :  { %p1601_p3 = pnand %p1599_p2, %p1596_p1 }
 0x410   :  { %1604 = shalt.err (!%p1601_p3)
}
 0x411   :  { %1298 = dma.vmem_to_hbm [thread:$0]  %s1293_s4, 1024, %s2557_s5, [#allocation7], %s1612_s28, %s1612_s28, %s1613_s29  }
 0x412   :  { %1609 = dma.done.wait [#allocation7], 1024  }
 0x413   :  { %1610 = vsyncadd [#allocation7], 4294966272 }
 0x414   :  { %1302 = vsyncpa [#allocation6], 1 }
 0x415   :  { %1303 = vsyncpa [#allocation9], 1 }
 0x416   :  { %1304 = vsyncpa [#allocation7], 1 }

</bundles_post_ra>
